<compile_context>
chip_gen: v7x
topology: tpu7x:2x2x1
jax: 0.10.0
libtpu: 0.0.40
codegen_flags: <defaults>
</compile_context>

<pallas_src>
import jax
import jax.numpy as jnp
from jax.experimental import pallas as pl
from jax.experimental.pallas import tpu as pltpu


def _clip_loss_kernel(scale_ref, img_ref, txt_ref, out_ref,
                      m_r_ref, l_r_ref, m_c_ref, l_c_ref, acc_ref):
    # grid axis 0 = image (logits-row) block, OUTER
    # grid axis 1 = text  (logits-col) block, INNER
    ji = pl.program_id(0)
    jt = pl.program_id(1)
    n_ji = pl.num_programs(0)
    n_jt = pl.num_programs(1)

    tm = img_ref.shape[0]          # image rows in this tile
    tn = txt_ref.shape[1]          # text cols in this tile
    scale = scale_ref[0]

    # Lane-dense slab of the persistent (1, N) column stats for this text block.
    if tn == m_c_ref.shape[1]:     # single text block (trace-time branch)
        col_idx = (slice(None), slice(None))
    else:                          # tn is a multiple of 128 -> aligned lane slice
        col_idx = (slice(None), pl.ds(pl.multiple_of(jt * tn, tn), tn))

    # ---------------- state init ----------------
    @pl.when((ji == 0) & (jt == 0))
    def _init_acc():
        acc_ref[0] = jnp.float32(0.0)

    @pl.when(ji == 0)
    def _init_col_stats():
        m_c_ref[col_idx] = jnp.full((1, tn), -jnp.inf, jnp.float32)
        l_c_ref[col_idx] = jnp.zeros((1, tn), jnp.float32)

    @pl.when(jt == 0)
    def _init_row_stats():
        m_r_ref[...] = jnp.full_like(m_r_ref, -jnp.inf)
        l_r_ref[...] = jnp.zeros_like(l_r_ref)

    # ---------------- logits tile (MXU, bf16 in / f32 accumulate) ----------------
    img = img_ref[...]             # (tm, D) bf16, resident across the inner axis
    txt = txt_ref[...]             # (D, tn) bf16, streamed; NN contraction, no transpose
    s = scale * jax.lax.dot_general(
        img, txt,
        dimension_numbers=(((1,), (0,)), ((), ())),
        preferred_element_type=jnp.float32)            # (tm, tn) f32

    # ---------------- online row-wise LSE (logits_per_image) ----------------
    m_r_old = m_r_ref[...]                             # (tm, 1)
    l_r_old = l_r_ref[...]
    m_r_new = jnp.maximum(m_r_old, jnp.max(s, axis=1, keepdims=True))
    p_r = jnp.exp(s - m_r_new)                         # (tm, tn)
    # Row sums on the MXU (ones-vector matmul) to keep the XLU free.
    row_sum = jax.lax.dot_general(
        p_r, jnp.ones((tn, 1), jnp.float32),
        dimension_numbers=(((1,), (0,)), ((), ())),
        preferred_element_type=jnp.float32)            # (tm, 1)
    l_r_new = l_r_old * jnp.exp(m_r_old - m_r_new) + row_sum
    m_r_ref[...] = m_r_new
    l_r_ref[...] = l_r_new

    # ---------------- online column-wise LSE (logits_per_text) ----------------
    m_c_old = m_c_ref[col_idx]                         # (1, tn)
    l_c_old = l_c_ref[col_idx]
    m_c_new = jnp.maximum(m_c_old, jnp.max(s, axis=0, keepdims=True))
    p_c = jnp.exp(s - m_c_new)                         # (tm, tn)
    col_sum = jax.lax.dot_general(
        jnp.ones((1, tm), jnp.float32), p_c,
        dimension_numbers=(((1,), (0,)), ((), ())),
        preferred_element_type=jnp.float32)            # (1, tn)
    l_c_new = l_c_old * jnp.exp(m_c_old - m_c_new) + col_sum
    m_c_ref[col_idx] = m_c_new
    l_c_ref[col_idx] = l_c_new

    # ---------------- diagonal (label) term, diagonal tiles only ----------------
    @pl.when(ji == jt)
    def _diag():
        r = jax.lax.broadcasted_iota(jnp.int32, (tm, tn), 0)
        c = jax.lax.broadcasted_iota(jnp.int32, (tm, tn), 1)
        diag = jnp.where(r == c, s, 0.0)               # diag of the f32 logits tile
        acc_ref[0] -= 2.0 * jnp.sum(diag)              # appears in both directions

    # ---------------- finalize rows of this image block ----------------
    @pl.when(jt == n_jt - 1)
    def _finalize_rows():
        acc_ref[0] += jnp.sum(m_r_new + jnp.log(l_r_new))

    # ---------------- finalize columns of this text block ----------------
    @pl.when(ji == n_ji - 1)
    def _finalize_cols():
        acc_ref[0] += jnp.sum(m_c_new + jnp.log(l_c_new))

    # ---------------- last grid step: normalize and emit ----------------
    @pl.when((ji == n_ji - 1) & (jt == n_jt - 1))
    def _store():
        n_total = tm * n_ji
        out_ref[0, 0] = acc_ref[0] * (0.5 / n_total)


def _round_up(x, m):
    return ((x + m - 1) // m) * m


def _pick_block(n, preferred=(256, 512, 128)):
    # 256 = MXU output tile on v6e/v7x and above the v5e HBM roofline crossover.
    # 512 halves the re-read traffic when it divides N (sweep on v6e).
    for b in preferred:
        if b <= n and n % b == 0:
            return b
    return n   # tiny / odd batch: single block


def _vmem_budget_bytes(n, d, blk):
    feat = 2                                              # bf16
    col_stats = 2 * 8 * _round_up(n, 128) * 4             # (1, N) f32 x2 (sublane-padded)
    row_stats = 2 * _round_up(blk, 8) * 128 * 4           # (blk, 1) f32 x2 (lane-padded)
    tiles = 2 * 2 * blk * d * feat                        # double-buffered img + txt tiles
    interm = 4 * blk * blk * 4                            # s, p_r, p_c f32 + slack
    return col_stats + row_stats + tiles + interm + (4 << 20)


def clip_loss(image_features, text_features, logit_scale, *, block=None):
    """ClipLoss.forward for world_size == 1 (mean of the two cross-entropies)."""
    n, d = image_features.shape
    assert text_features.shape == (n, d), (image_features.shape, text_features.shape)
    blk = block if block is not None else _pick_block(n)
    assert n % blk == 0, (n, blk)
    assert blk % 128 == 0 or blk == n, (n, blk)   # lane-aligned col-stat slabs
    nb = n // blk

    # bf16 into the MXU (f32 accumulation in-kernel); text pre-transposed once
    # in XLA so the per-tile contraction is NN (no in-kernel XLU transpose).
    img = image_features.astype(jnp.bfloat16)
    txt_t = jnp.transpose(text_features.astype(jnp.bfloat16))   # (D, N)
    scale = jnp.reshape(jnp.asarray(logit_scale, jnp.float32), (1,))

    feat_itemsize = 2
    cost = pl.CostEstimate(
        flops=2 * n * n * d + 4 * n * n + 12 * n * n,   # matmul + ones-sums + softmax VPU
        transcendentals=2 * n * n,                      # exp in both directions
        bytes_accessed=(nb + 1) * n * d * feat_itemsize + 8,
    )

    vmem_limit = int(min(max(_vmem_budget_bytes(n, d, blk), 16 << 20), 96 << 20))

    grid_spec = pltpu.PrefetchScalarGridSpec(
        num_scalar_prefetch=0,
        grid=(nb, nb),                                  # (image block [outer], text block [inner])
        in_specs=[
            pl.BlockSpec(memory_space=pltpu.MemorySpace.SMEM),       # logit_scale
            pl.BlockSpec((blk, d), lambda ji, jt: (ji, 0)),          # image tile (resident per outer step)
            pl.BlockSpec((d, blk), lambda ji, jt: (0, jt)),          # text tile (streamed, lane-dense)
        ],
        out_specs=pl.BlockSpec(memory_space=pltpu.MemorySpace.SMEM), # scalar loss
        scratch_shapes=[
            pltpu.VMEM((blk, 1), jnp.float32),   # running row max   (current image block)
            pltpu.VMEM((blk, 1), jnp.float32),   # running row sum-exp
            pltpu.VMEM((1, n), jnp.float32),     # running col max   (all text cols, lane-dense)
            pltpu.VMEM((1, n), jnp.float32),     # running col sum-exp
            pltpu.SMEM((1,), jnp.float32),       # scalar loss accumulator
        ],
    )

    out = pl.pallas_call(
        _clip_loss_kernel,
        out_shape=jax.ShapeDtypeStruct((1, 1), jnp.float32),
        grid_spec=grid_spec,
        compiler_params=pltpu.CompilerParams(
            # Both grid axes carry online-LSE state, so they stay sequential.
            # TODO(synk): v7x megacore split of the outer axis with per-core
            # partial (m_c, l_c, acc) + an epilogue merge.
            dimension_semantics=("arbitrary", "arbitrary"),
            vmem_limit_bytes=vmem_limit,
        ),
        cost_estimate=cost,
    )(scale, img, txt_t)
    return out[0, 0]


def _reference_clip_loss(image_features, text_features, logit_scale):
    img = image_features.astype(jnp.float32)
    txt = text_features.astype(jnp.float32)
    logits_i = logit_scale * img @ txt.T
    logits_t = logit_scale * txt @ img.T
    labels = jnp.arange(img.shape[0])

    def ce(logits):
        lse = jax.scipy.special.logsumexp(logits, axis=1)
        tgt = jnp.take_along_axis(logits, labels[:, None], axis=1)[:, 0]
        return jnp.mean(lse - tgt)

    return (ce(logits_i) + ce(logits_t)) / 2.0


if __name__ == "__main__":
    key = jax.random.PRNGKey(0)
    k_img, k_txt = jax.random.split(key)

    N, D = 256, 64  # 2x2 grid of 128x128 logits tiles (small but exercises tiling)
    image_features = jax.random.normal(k_img, (N, D), dtype=jnp.float32)
    text_features = jax.random.normal(k_txt, (N, D), dtype=jnp.float32)
    # L2-normalize as CLIP does upstream of the loss (glue, not part of the loss)
    image_features = image_features / jnp.linalg.norm(image_features, axis=-1, keepdims=True)
    text_features = text_features / jnp.linalg.norm(text_features, axis=-1, keepdims=True)
    logit_scale = jnp.exp(jnp.float32(jnp.log(1.0 / 0.07)))  # standard CLIP init

    loss = clip_loss(image_features, text_features, logit_scale, block=128)
    jax.block_until_ready(loss)

    # Tight check: same bf16-cast features, f32 math (validates the kernel algorithm).
    ref_bf16 = _reference_clip_loss(image_features.astype(jnp.bfloat16),
                                    text_features.astype(jnp.bfloat16), logit_scale)
    assert jnp.allclose(loss, ref_bf16, rtol=2e-3, atol=2e-3), (loss, ref_bf16)

    # Loose sanity check vs the full-precision reference (bf16 feature-cast noise).
    ref_f32 = _reference_clip_loss(image_features, text_features, logit_scale)
    assert jnp.allclose(loss, ref_f32, rtol=2e-2, atol=2e-2), (loss, ref_f32)

    print("KERNEL_OK")
</pallas_src>

<mosaic_0001>
module attributes {stable_mosaic.version = 11 : i64} {
  func.func @_clip_loss_kernel(%arg0: i32, %arg1: i32, %arg2: memref<1xf32, #tpu.memory_space<smem>>, %arg3: memref<128x64xbf16, #tpu.memory_space<vmem>>, %arg4: memref<64x128xbf16, #tpu.memory_space<vmem>>, %arg5: memref<1x1xf32, #tpu.memory_space<smem>>, %arg6: memref<128x1xf32, #tpu.memory_space<vmem>>, %arg7: memref<128x1xf32, #tpu.memory_space<vmem>>, %arg8: memref<1x256xf32, #tpu.memory_space<vmem>>, %arg9: memref<1x256xf32, #tpu.memory_space<vmem>>, %arg10: memref<1xf32, #tpu.memory_space<smem>>) attributes {dimension_semantics = [#tpu.dimension_semantics<arbitrary>, #tpu.dimension_semantics<arbitrary>], iteration_bounds = array<i64: 2, 2>, scalar_prefetch = 0 : i64, scratch_operands = 5 : i64, tpu.core_type = #tpu.core_type<tc>, window_params = [{transform_indices = @transform_0, window_bounds = array<i64: 1>}, {transform_indices = @transform_1, window_bounds = array<i64: 128, 64>}, {transform_indices = @transform_2, window_bounds = array<i64: 64, 128>}, {transform_indices = @transform_3, window_bounds = array<i64: 1, 1>}]} {
    %c0 = arith.constant 0 : index
    %0 = memref.load %arg2[%c0] : memref<1xf32, #tpu.memory_space<smem>>
    %c128_i32 = arith.constant 128 : i32
    %1 = arith.muli %arg1, %c128_i32 : i32
    %2 = tpu.assume_multiple %1, 128 : i32
    %c0_i32 = arith.constant 0 : i32
    %3 = arith.cmpi eq, %arg0, %c0_i32 : i32
    %c0_i32_0 = arith.constant 0 : i32
    %4 = arith.cmpi eq, %arg1, %c0_i32_0 : i32
    %5 = arith.andi %3, %4 : i1
    %6 = arith.extui %5 : i1 to i32
    %c0_i32_1 = arith.constant 0 : i32
    %7 = arith.cmpi ne, %6, %c0_i32_1 : i32
    scf.if %7 {
      %cst_35 = arith.constant 0.000000e+00 : f32
      %c0_36 = arith.constant 0 : index
      %69 = memref.load %arg10[%c0_36] : memref<1xf32, #tpu.memory_space<smem>>
      memref.store %cst_35, %arg10[%c0_36] : memref<1xf32, #tpu.memory_space<smem>>
    } else {
    }
    %c0_i32_2 = arith.constant 0 : i32
    %8 = arith.cmpi eq, %arg0, %c0_i32_2 : i32
    %9 = arith.extui %8 : i1 to i32
    %c0_i32_3 = arith.constant 0 : i32
    %10 = arith.cmpi ne, %9, %c0_i32_3 : i32
    scf.if %10 {
      %cst_35 = arith.constant 0xFF800000 : f32
      %69 = vector.broadcast %cst_35 : f32 to vector<1x128xf32>
      %c0_36 = arith.constant 0 : index
      %70 = arith.index_cast %2 : i32 to index
      %71 = vector.load %arg8[%c0_36, %70] : memref<1x256xf32, #tpu.memory_space<vmem>>, vector<1x128xf32>
      tpu.vector_store %arg8[%c0_36, %70], %69 {strides = array<i32>} : memref<1x256xf32, #tpu.memory_space<vmem>>, vector<1x128xf32>,
      %cst_37 = arith.constant 0.000000e+00 : f32
      %72 = vector.broadcast %cst_37 : f32 to vector<1x128xf32>
      %c0_38 = arith.constant 0 : index
      %73 = arith.index_cast %2 : i32 to index
      %74 = vector.load %arg9[%c0_38, %73] : memref<1x256xf32, #tpu.memory_space<vmem>>, vector<1x128xf32>
      tpu.vector_store %arg9[%c0_38, %73], %72 {strides = array<i32>} : memref<1x256xf32, #tpu.memory_space<vmem>>, vector<1x128xf32>,
    } else {
    }
    %c0_i32_4 = arith.constant 0 : i32
    %11 = arith.cmpi eq, %arg1, %c0_i32_4 : i32
    %12 = arith.extui %11 : i1 to i32
    %c0_i32_5 = arith.constant 0 : i32
    %13 = arith.cmpi ne, %12, %c0_i32_5 : i32
    scf.if %13 {
      %cst_35 = arith.constant 0xFF800000 : f32
      %69 = vector.broadcast %cst_35 : f32 to vector<128x1xf32>
      %c0_36 = arith.constant 0 : index
      %c0_37 = arith.constant 0 : index
      %70 = vector.load %arg6[%c0_36, %c0_37] : memref<128x1xf32, #tpu.memory_space<vmem>>, vector<128x1xf32>
      tpu.vector_store %arg6[%c0_36, %c0_37], %69 {strides = array<i32>} : memref<128x1xf32, #tpu.memory_space<vmem>>, vector<128x1xf32>,
      %cst_38 = arith.constant 0.000000e+00 : f32
      %71 = vector.broadcast %cst_38 : f32 to vector<128x1xf32>
      %c0_39 = arith.constant 0 : index
      %c0_40 = arith.constant 0 : index
      %72 = vector.load %arg7[%c0_39, %c0_40] : memref<128x1xf32, #tpu.memory_space<vmem>>, vector<128x1xf32>
      tpu.vector_store %arg7[%c0_39, %c0_40], %71 {strides = array<i32>} : memref<128x1xf32, #tpu.memory_space<vmem>>, vector<128x1xf32>,
    } else {
    }
    %c0_6 = arith.constant 0 : index
    %c0_7 = arith.constant 0 : index
    %14 = vector.load %arg3[%c0_6, %c0_7] : memref<128x64xbf16, #tpu.memory_space<vmem>>, vector<128x64xbf16>
    %c0_8 = arith.constant 0 : index
    %c0_9 = arith.constant 0 : index
    %15 = vector.load %arg4[%c0_8, %c0_9] : memref<64x128xbf16, #tpu.memory_space<vmem>>, vector<64x128xbf16>
    %cst = arith.constant dense<0.000000e+00> : vector<128x128xf32>
    %16 = tpu.matmul %14, %15, %cst {dimension_numbers = #tpu.dot_dimension_numbers<[1], [0], [0], [1], [0, 0, 1, 1], [], []>} : vector<128x64xbf16>, vector<64x128xbf16>, vector<128x128xf32> -> vector<128x128xf32>
    %17 = vector.broadcast %0 : f32 to vector<128x128xf32>
    %18 = arith.mulf %17, %16 : vector<128x128xf32>
    %c0_10 = arith.constant 0 : index
    %c0_11 = arith.constant 0 : index
    %19 = vector.load %arg6[%c0_10, %c0_11] : memref<128x1xf32, #tpu.memory_space<vmem>>, vector<128x1xf32>
    %c0_12 = arith.constant 0 : index
    %c0_13 = arith.constant 0 : index
    %20 = vector.load %arg7[%c0_12, %c0_13] : memref<128x1xf32, #tpu.memory_space<vmem>>, vector<128x1xf32>
    %cst_14 = arith.constant dense<0xFF800000> : vector<128xf32>
    %21 = vector.multi_reduction <maximumf>, %18, %cst_14 [1] : vector<128x128xf32> to vector<128xf32>
    %22 = vector.shape_cast %21 : vector<128xf32> to vector<128x1xf32>
    %23 = arith.maximumf %19, %22 : vector<128x1xf32>
    %24 = vector.broadcast %23 : vector<128x1xf32> to vector<128x128xf32>
    %25 = arith.subf %18, %24 : vector<128x128xf32>
    %26 = math.exp %25 : vector<128x128xf32>
    %cst_15 = arith.constant 1.000000e+00 : f32
    %27 = vector.broadcast %cst_15 : f32 to vector<128x1xf32>
    %cst_16 = arith.constant dense<0.000000e+00> : vector<128x1xf32>
    %28 = tpu.matmul %26, %27, %cst_16 {dimension_numbers = #tpu.dot_dimension_numbers<[1], [0], [0], [1], [0, 0, 1, 1], [], []>} : vector<128x128xf32>, vector<128x1xf32>, vector<128x1xf32> -> vector<128x1xf32>
    %29 = arith.subf %19, %23 : vector<128x1xf32>
    %30 = math.exp %29 : vector<128x1xf32>
    %31 = arith.mulf %20, %30 : vector<128x1xf32>
    %32 = arith.addf %31, %28 : vector<128x1xf32>
    %c0_17 = arith.constant 0 : index
    %c0_18 = arith.constant 0 : index
    %33 = vector.load %arg6[%c0_17, %c0_18] : memref<128x1xf32, #tpu.memory_space<vmem>>, vector<128x1xf32>
    tpu.vector_store %arg6[%c0_17, %c0_18], %23 {strides = array<i32>} : memref<128x1xf32, #tpu.memory_space<vmem>>, vector<128x1xf32>,
    %c0_19 = arith.constant 0 : index
    %c0_20 = arith.constant 0 : index
    %34 = vector.load %arg7[%c0_19, %c0_20] : memref<128x1xf32, #tpu.memory_space<vmem>>, vector<128x1xf32>
    tpu.vector_store %arg7[%c0_19, %c0_20], %32 {strides = array<i32>} : memref<128x1xf32, #tpu.memory_space<vmem>>, vector<128x1xf32>,
    %c0_21 = arith.constant 0 : index
    %35 = arith.index_cast %2 : i32 to index
    %36 = vector.load %arg8[%c0_21, %35] : memref<1x256xf32, #tpu.memory_space<vmem>>, vector<1x128xf32>
    %c0_22 = arith.constant 0 : index
    %37 = arith.index_cast %2 : i32 to index
    %38 = vector.load %arg9[%c0_22, %37] : memref<1x256xf32, #tpu.memory_space<vmem>>, vector<1x128xf32>
    %cst_23 = arith.constant dense<0xFF800000> : vector<128xf32>
    %39 = vector.multi_reduction <maximumf>, %18, %cst_23 [0] : vector<128x128xf32> to vector<128xf32>
    %40 = vector.shape_cast %39 : vector<128xf32> to vector<1x128xf32>
    %41 = arith.maximumf %36, %40 : vector<1x128xf32>
    %42 = vector.broadcast %41 : vector<1x128xf32> to vector<128x128xf32>
    %43 = arith.subf %18, %42 : vector<128x128xf32>
    %44 = math.exp %43 : vector<128x128xf32>
    %cst_24 = arith.constant 1.000000e+00 : f32
    %45 = vector.broadcast %cst_24 : f32 to vector<1x128xf32>
    %cst_25 = arith.constant dense<0.000000e+00> : vector<1x128xf32>
    %46 = tpu.matmul %45, %44, %cst_25 {dimension_numbers = #tpu.dot_dimension_numbers<[1], [0], [0], [1], [0, 0, 1, 1], [], []>} : vector<1x128xf32>, vector<128x128xf32>, vector<1x128xf32> -> vector<1x128xf32>
    %47 = arith.subf %36, %41 : vector<1x128xf32>
    %48 = math.exp %47 : vector<1x128xf32>
    %49 = arith.mulf %38, %48 : vector<1x128xf32>
    %50 = arith.addf %49, %46 : vector<1x128xf32>
    %c0_26 = arith.constant 0 : index
    %51 = arith.index_cast %2 : i32 to index
    %52 = vector.load %arg8[%c0_26, %51] : memref<1x256xf32, #tpu.memory_space<vmem>>, vector<1x128xf32>
    tpu.vector_store %arg8[%c0_26, %51], %41 {strides = array<i32>} : memref<1x256xf32, #tpu.memory_space<vmem>>, vector<1x128xf32>,
    %c0_27 = arith.constant 0 : index
    %53 = arith.index_cast %2 : i32 to index
    %54 = vector.load %arg9[%c0_27, %53] : memref<1x256xf32, #tpu.memory_space<vmem>>, vector<1x128xf32>
    tpu.vector_store %arg9[%c0_27, %53], %50 {strides = array<i32>} : memref<1x256xf32, #tpu.memory_space<vmem>>, vector<1x128xf32>,
    %55 = arith.cmpi eq, %arg0, %arg1 : i32
    %56 = arith.extui %55 : i1 to i32
    %c0_i32_28 = arith.constant 0 : i32
    %57 = arith.cmpi ne, %56, %c0_i32_28 : i32
    scf.if %57 {
      %69 = tpu.iota {dimensions = array<i32: 0>} : vector<128x128xi32>
      %70 = tpu.iota {dimensions = array<i32: 1>} : vector<128x128xi32>
      %71 = arith.cmpi eq, %69, %70 : vector<128x128xi32>
      %cst_35 = arith.constant 0.000000e+00 : f32
      %72 = vector.broadcast %cst_35 : f32 to vector<128x128xf32>
      %73 = arith.select %71, %18, %72 : vector<128x128xi1>, vector<128x128xf32>
      %c0_36 = arith.constant 0 : index
      %74 = memref.load %arg10[%c0_36] : memref<1xf32, #tpu.memory_space<smem>>
      %75 = vector.shape_cast %73 : vector<128x128xf32> to vector<1x128x128xf32>
      %cst_37 = arith.constant dense<0.000000e+00> : vector<1xf32>
      %76 = vector.multi_reduction <add>, %75, %cst_37 [1, 2] : vector<1x128x128xf32> to vector<1xf32>
      %77 = vector.shape_cast %76 : vector<1xf32> to vector<1x1x1xf32>
      %78 = vector.extract %77[0, 0, 0] : f32 from vector<1x1x1xf32>
      %cst_38 = arith.constant 2.000000e+00 : f32
      %79 = arith.mulf %cst_38, %78 : f32
      %80 = arith.subf %74, %79 : f32
      %c0_39 = arith.constant 0 : index
      %81 = memref.load %arg10[%c0_39] : memref<1xf32, #tpu.memory_space<smem>>
      memref.store %80, %arg10[%c0_39] : memref<1xf32, #tpu.memory_space<smem>>
    } else {
    }
    %c1_i32 = arith.constant 1 : i32
    %58 = arith.cmpi eq, %arg1, %c1_i32 : i32
    %59 = arith.extui %58 : i1 to i32
    %c0_i32_29 = arith.constant 0 : i32
    %60 = arith.cmpi ne, %59, %c0_i32_29 : i32
    scf.if %60 {
      %c0_35 = arith.constant 0 : index
      %69 = memref.load %arg10[%c0_35] : memref<1xf32, #tpu.memory_space<smem>>
      %70 = math.log %32 : vector<128x1xf32>
      %71 = arith.addf %23, %70 : vector<128x1xf32>
      %72 = vector.shape_cast %71 : vector<128x1xf32> to vector<1x128x1xf32>
      %cst_36 = arith.constant dense<0.000000e+00> : vector<1xf32>
      %73 = vector.multi_reduction <add>, %72, %cst_36 [1, 2] : vector<1x128x1xf32> to vector<1xf32>
      %74 = vector.shape_cast %73 : vector<1xf32> to vector<1x1x1xf32>
      %75 = vector.extract %74[0, 0, 0] : f32 from vector<1x1x1xf32>
      %76 = arith.addf %69, %75 : f32
      %c0_37 = arith.constant 0 : index
      %77 = memref.load %arg10[%c0_37] : memref<1xf32, #tpu.memory_space<smem>>
      memref.store %76, %arg10[%c0_37] : memref<1xf32, #tpu.memory_space<smem>>
    } else {
    }
    %c1_i32_30 = arith.constant 1 : i32
    %61 = arith.cmpi eq, %arg0, %c1_i32_30 : i32
    %62 = arith.extui %61 : i1 to i32
    %c0_i32_31 = arith.constant 0 : i32
    %63 = arith.cmpi ne, %62, %c0_i32_31 : i32
    scf.if %63 {
      %c0_35 = arith.constant 0 : index
      %69 = memref.load %arg10[%c0_35] : memref<1xf32, #tpu.memory_space<smem>>
      %70 = math.log %50 : vector<1x128xf32>
      %71 = arith.addf %41, %70 : vector<1x128xf32>
      %72 = vector.shape_cast %71 : vector<1x128xf32> to vector<1x1x128xf32>
      %cst_36 = arith.constant dense<0.000000e+00> : vector<1xf32>
      %73 = vector.multi_reduction <add>, %72, %cst_36 [1, 2] : vector<1x1x128xf32> to vector<1xf32>
      %74 = vector.shape_cast %73 : vector<1xf32> to vector<1x1x1xf32>
      %75 = vector.extract %74[0, 0, 0] : f32 from vector<1x1x1xf32>
      %76 = arith.addf %69, %75 : f32
      %c0_37 = arith.constant 0 : index
      %77 = memref.load %arg10[%c0_37] : memref<1xf32, #tpu.memory_space<smem>>
      memref.store %76, %arg10[%c0_37] : memref<1xf32, #tpu.memory_space<smem>>
    } else {
    }
    %c1_i32_32 = arith.constant 1 : i32
    %64 = arith.cmpi eq, %arg0, %c1_i32_32 : i32
    %c1_i32_33 = arith.constant 1 : i32
    %65 = arith.cmpi eq, %arg1, %c1_i32_33 : i32
    %66 = arith.andi %64, %65 : i1
    %67 = arith.extui %66 : i1 to i32
    %c0_i32_34 = arith.constant 0 : i32
    %68 = arith.cmpi ne, %67, %c0_i32_34 : i32
    scf.if %68 {
      %c0_35 = arith.constant 0 : index
      %69 = memref.load %arg10[%c0_35] : memref<1xf32, #tpu.memory_space<smem>>
      %cst_36 = arith.constant 0.001953125 : f32
      %70 = arith.mulf %69, %cst_36 : f32
      %c0_37 = arith.constant 0 : index
      %c0_38 = arith.constant 0 : index
      %71 = memref.load %arg5[%c0_37, %c0_38] : memref<1x1xf32, #tpu.memory_space<smem>>
      memref.store %70, %arg5[%c0_37, %c0_38] : memref<1x1xf32, #tpu.memory_space<smem>>
    } else {
    }
    return
  }
  func.func @transform_0(%arg0: i32, %arg1: i32) -> i32 {
    %c0_i32 = arith.constant 0 : i32
    %c0_i32_0 = arith.constant 0 : i32
    return %c0_i32 : i32
  }
  func.func @transform_1(%arg0: i32, %arg1: i32) -> (i32, i32) {
    %c0_i32 = arith.constant 0 : i32
    %c0_i32_0 = arith.constant 0 : i32
    return %arg0, %c0_i32 : i32, i32
  }
  func.func @transform_2(%arg0: i32, %arg1: i32) -> (i32, i32) {
    %c0_i32 = arith.constant 0 : i32
    %c0_i32_0 = arith.constant 0 : i32
    return %c0_i32, %arg1 : i32, i32
  }
  func.func @transform_3(%arg0: i32, %arg1: i32) -> (i32, i32) {
    %c0_i32 = arith.constant 0 : i32
    %c0_i32_0 = arith.constant 0 : i32
    %c0_i32_1 = arith.constant 0 : i32
    return %c0_i32, %c0_i32_0 : i32, i32
  }
}

</mosaic_0001>

<bundles_post_ra>
// kernel: tpu_custom_call.1
= control target key start
LH: loop header
LB: loop body
LE: loop exit
PB: predicated region body
PF: predicated region fallthrough
CT: control target
= control target key end

     0   :  { %s2761_s0 = inlined_call_operand.<no memory space> [shape: f32[1], index: 0, kind: input, shape index: {}]   ;;  %s2762_s1 = inlined_call_operand.vmem [shape: bf16[256,64], index: 1, kind: input, shape index: {}]   ;;  %s2763_s2 = inlined_call_operand.vmem [shape: bf16[64,256], index: 2, kind: input, shape index: {}]   ;;  %s2764_s3 = inlined_call_operand.hbm [shape: f32[1,1], index: 3, kind: output, shape index: {}]  }
   0x1   :  { %8 = sst [smem:[#allocation7]] %s2761_s0 }
   0x2   :  { %9 = vsyncpa [#allocation10], 0  ;;  %s2058_s14 = smov 0   ;;  %s2060_s15 = smov 0  }
   0x3   :  { %s2062_s16 = smov 0   ;;  %s2064_s17 = smov 0  }
   0x4   :  { %s2066_s18 = smov 0   ;;  %s2068_s19 = smov 0  }
   0x5   :  { %s2070_s20 = smov 0  }
   0x6 LB: > { %s1466_s0 = sadd.s32 4294967295, %s2021_s20   ;;  %s24_s21 = sadd.s32 1, %s2013_s18  ;;  %s2021_s20 = sphi %s2070_s20, %s15_s20   ;;  %s2017_s19 = sphi %s2068_s19, %s2806_s19   ;;  %s2013_s18 = sphi %s2066_s18, %s2805_s18   ;;  %s2009_s17 = sphi %s2064_s17, %s2804_s17   ;;  %s2005_s16 = sphi %s2062_s16, %s2803_s16   ;;  %s2001_s15 = sphi %s2060_s15, %s2802_s15   ;;  %s1997_s14 = sphi %s2058_s14, %s2801_s14  }
   0x7   : > { %p25_p0 = scmp.ge.s32.totalorder %s24_s21, 2  ;;  %s27_s22 = sadd.s32 1, %s2017_s19 }
   0x8   : > { %s81_s23 = sadd.s32 1, %s2001_s15  ;;  %p88_p1 = scmp.ne.s32.totalorder %s2001_s15, %s1997_s14 }
   0x9   : > { %s2808_s21 = smov (%p25_p0, %s24_s21), 0  ;;  %s2810_s22 = smov (!%p25_p0, %s27_s22), %s2017_s19 }
   0xa   : > { %s78_s24 = ssub.s32 %s2013_s18, %s2808_s21  ;;  %p89_p2 = scmp.eq.s32.totalorder %s2021_s20, 0 }
   0xb   : > { %p29_p3 = scmp.ge.s32.totalorder %s2810_s22, 2  ;;  %p79_p4 = scmp.eq.s32.totalorder %s78_s24, 0 }
   0xc   : > { %p90_p5 = por %p89_p2, %p88_p1  ;;  %p1468_p6 = scmp.ge.s32.totalorder %s2021_s20, 4 }
   0xd   : > { %s2812_s22 = smov (%p29_p3, %s2810_s22), 0 }
   0xe   : > { %s2108_s25 = scalar_select %p79_p4, %s2001_s15, %s81_s23  }
   0xf   : > { %138 = sbr.rel (%p1468_p6) target bundleno = 31 (0x1f), region = 20 }
  0x16   : > { %150 = sbr.rel (!%p90_p5) target bundleno = 31 (0x1f), region = 28  ;;  %s152_s26 = sand.u32 (%p90_p5), 1, %s2001_s15  }
  0x17   : > { %s1470_s27 = sshll.u32 (%p90_p5), %s2013_s18, 2  ;;  %s1469_s28 = sshll.u32 (%p90_p5), %s152_s26, 5 }
  0x18   : > { %s156_s4 = scalar_lea.vmem (%p90_p5), %s2763_s2, %s1470_s27  ;;  %s154_s5 = scalar_lea.vmem (%p90_p5), [#allocation8], %s1469_s28 }
  0x19   : > { %v172_v0 = vld [vmem:[%s156_s4] sm:$0xf] (%p90_p5)  ;;  %v174_v1 = vld [vmem:[%s156_s4 + $0x8] sm:$0xf] (%p90_p5)  ;;  %v176_v2 = vld [vmem:[%s156_s4 + $0x10] sm:$0xf] (%p90_p5) }
  0x1a   : > { %173 = vst [vmem:[%s154_s5] sm:$0xf] (%p90_p5), %v172_v0  ;;  %175 = vst [vmem:[%s154_s5 + $0x4] sm:$0xf] (%p90_p5), %v174_v1  ;;  %v178_v3 = vld [vmem:[%s156_s4 + $0x18] sm:$0xf] (%p90_p5) }
  0x1b   : > { %v180_v4 = vld [vmem:[%s156_s4 + $0x20] sm:$0xf] (%p90_p5)  ;;  %177 = vst [vmem:[%s154_s5 + $0x8] sm:$0xf] (%p90_p5), %v176_v2  ;;  %179 = vst [vmem:[%s154_s5 + $0xc] sm:$0xf] (%p90_p5), %v178_v3 }
  0x1c   : > { %181 = vst [vmem:[%s154_s5 + $0x10] sm:$0xf] (%p90_p5), %v180_v4  ;;  %v182_v5 = vld [vmem:[%s156_s4 + $0x28] sm:$0xf] (%p90_p5)  ;;  %v184_v6 = vld [vmem:[%s156_s4 + $0x30] sm:$0xf] (%p90_p5) }
  0x1d   : > { %v186_v7 = vld [vmem:[%s156_s4 + $0x38] sm:$0xf]  ;;  %183 = vst [vmem:[%s154_s5 + $0x14] sm:$0xf] %v182_v5  ;;  %185 = vst [vmem:[%s154_s5 + $0x18] sm:$0xf] %v184_v6 }
  0x1e   : > { %187 = vst [vmem:[%s154_s5 + $0x1c] sm:$0xf] %v186_v7 }
  0x1f PF: > { %p1471_p7 = scmp.ge.s32.totalorder %s2021_s20, 1  ;;  %p225_p8 = scmp.lt.s32.totalorder %s2021_s20, 5 }
  0x21   : > { %p226_p9 = pnand %p1471_p7, %p225_p8 }
  0x23   : > { %229 = sbr.rel (%p226_p9) target bundleno = 1582 (0x62e), region = 69 }
  0x2a   : > { %s232_s6 = sand.u32 1, %s1997_s14   ;;  %s1473_s7 = sshll.u32 %s2009_s17, 4 }
  0x2b   : > { %s1472_s8 = sshll.u32 %s232_s6, 5  ;;  %p256_p10 = scmp.lt.s32.totalorder %s1473_s7, 31 }
  0x2c   : > { %s2120_s9 = sld [smem:[#allocation7]]  ;;  %s1475_s10 = sshll.u32 %s2005_s16, 7 }
  0x2d   : > { %s2814_s7 = smov (!%p256_p10, %s1473_s7), 31  ;;  %p264_p11 = scmp.eq.s32.totalorder %s2009_s17, 0 }
  0x2e   : > { %s1474_s11 = sshll.u32 %s2814_s7, 2  ;;  %p265_p12 = scmp.eq.s32.totalorder %s2005_s16, 0 }
  0x2f   : > { %s2128_s23 = scalar_lea.vmem %s2762_s1, %s1474_s11  ;;  %s2023_s24 = smov 0.0  }
  0x30   : > { %p266_p13 = pnand %p265_p12, %p264_p11  ;;  %s2130_s26 = scalar_lea.vmem [#allocation8], %s1472_s8 }
  0x31   : > { %p1476_p0 = scmp.ne.s32.totalorder %s2009_s17, 0 }
  0x32   : > { %1728 = sst [smem:[#allocation6]] (!%p266_p13), %s2023_s24  ;;  %s275_s14 = sshra.s32 (!%p1476_p0), %s1475_s10, 7  ;;  %v278_v8 = vlaneseq (!%p1476_p0)  ;;  %v2024_v9 = vmov (!%p1476_p0), -inf   ;;  %v2025_v10 = vmov (!%p1476_p0), 0.0  }
  0x33   : > { %274 = sbr.rel (%p1476_p0) target bundleno = 58 (0x3a), region = 81  ;;  %s277_s27 = scalar_lea.vmem (!%p1476_p0), [#allocation4], %s275_s14 }
  0x34   : > { %vm280_vm0 = vcmp.lt.s32.totalorder (!%p1476_p0), %v278_v8, 128  ;;  %s283_s28 = scalar_lea.vmem (!%p1476_p0), [#allocation5], %s275_s14 }
  0x35   : > { %282 = vst.msk [vmem:[%s277_s27] sm:$0x1] (!%p1476_p0), %vm280_vm0, %v2024_v9  ;;  %284 = vst.msk [vmem:[%s283_s28] sm:$0x1] (!%p1476_p0), %vm280_vm0, %v2025_v10 }
  0x3a PF: > { %p1477_p1 = scmp.ne.s32.totalorder %s2005_s16, 0 }
  0x3b   : > { %vm288_vm1 = vcmask (!%p1477_p1), 7168   ;;  %v2026_v11 = vmov (!%p1477_p1), -inf   ;;  %v2027_v12 = vmov (!%p1477_p1), 0.0  }
  0x3c   : > { %287 = sbr.rel (%p1477_p1) target bundleno = 76 (0x4c), region = 85  ;;  %289 = vst.msk [vmem:[#allocation2] sm:$0xff] (!%p1477_p1), %vm288_vm1, %v2026_v11  ;;  %290 = vst.msk [vmem:[#allocation2 + $0x8] sm:$0xff] (!%p1477_p1), %vm288_vm1, %v2026_v11 }
  0x3d   : > { %291 = vst.msk [vmem:[#allocation2 + $0x10] sm:$0xff] (!%p1477_p1), %vm288_vm1, %v2026_v11  ;;  %292 = vst.msk [vmem:[#allocation2 + $0x18] sm:$0xff] (!%p1477_p1), %vm288_vm1, %v2026_v11 }
  0x3e   : > { %293 = vst.msk [vmem:[#allocation2 + $0x20] sm:$0xff] (!%p1477_p1), %vm288_vm1, %v2026_v11  ;;  %294 = vst.msk [vmem:[#allocation2 + $0x28] sm:$0xff] (!%p1477_p1), %vm288_vm1, %v2026_v11 }
  0x3f   : > { %295 = vst.msk [vmem:[#allocation2 + $0x30] sm:$0xff] (!%p1477_p1), %vm288_vm1, %v2026_v11  ;;  %296 = vst.msk [vmem:[#allocation2 + $0x38] sm:$0xff] (!%p1477_p1), %vm288_vm1, %v2026_v11 }
  0x40   : > { %297 = vst.msk [vmem:[#allocation2 + $0x40] sm:$0xff] (!%p1477_p1), %vm288_vm1, %v2026_v11  ;;  %298 = vst.msk [vmem:[#allocation2 + $0x48] sm:$0xff] (!%p1477_p1), %vm288_vm1, %v2026_v11 }
  0x41   : > { %299 = vst.msk [vmem:[#allocation2 + $0x50] sm:$0xff] (!%p1477_p1), %vm288_vm1, %v2026_v11  ;;  %300 = vst.msk [vmem:[#allocation2 + $0x58] sm:$0xff] (!%p1477_p1), %vm288_vm1, %v2026_v11 }
  0x42   : > { %301 = vst.msk [vmem:[#allocation2 + $0x60] sm:$0xff] (!%p1477_p1), %vm288_vm1, %v2026_v11  ;;  %302 = vst.msk [vmem:[#allocation2 + $0x68] sm:$0xff] (!%p1477_p1), %vm288_vm1, %v2026_v11 }
  0x43   : > { %303 = vst.msk [vmem:[#allocation2 + $0x70] sm:$0xff] %vm288_vm1, %v2026_v11  ;;  %304 = vst.msk [vmem:[#allocation2 + $0x78] sm:$0xff] %vm288_vm1, %v2026_v11 }
  0x44   : > { %305 = vst.msk [vmem:[#allocation3] sm:$0xff] %vm288_vm1, %v2027_v12  ;;  %306 = vst.msk [vmem:[#allocation3 + $0x8] sm:$0xff] %vm288_vm1, %v2027_v12 }
  0x45   : > { %307 = vst.msk [vmem:[#allocation3 + $0x10] sm:$0xff] %vm288_vm1, %v2027_v12  ;;  %308 = vst.msk [vmem:[#allocation3 + $0x18] sm:$0xff] %vm288_vm1, %v2027_v12 }
  0x46   : > { %309 = vst.msk [vmem:[#allocation3 + $0x20] sm:$0xff] %vm288_vm1, %v2027_v12  ;;  %310 = vst.msk [vmem:[#allocation3 + $0x28] sm:$0xff] %vm288_vm1, %v2027_v12 }
  0x47   : > { %311 = vst.msk [vmem:[#allocation3 + $0x30] sm:$0xff] %vm288_vm1, %v2027_v12  ;;  %312 = vst.msk [vmem:[#allocation3 + $0x38] sm:$0xff] %vm288_vm1, %v2027_v12 }
  0x48   : > { %313 = vst.msk [vmem:[#allocation3 + $0x40] sm:$0xff] %vm288_vm1, %v2027_v12  ;;  %314 = vst.msk [vmem:[#allocation3 + $0x48] sm:$0xff] %vm288_vm1, %v2027_v12 }
  0x49   : > { %315 = vst.msk [vmem:[#allocation3 + $0x50] sm:$0xff] %vm288_vm1, %v2027_v12  ;;  %316 = vst.msk [vmem:[#allocation3 + $0x58] sm:$0xff] %vm288_vm1, %v2027_v12 }
  0x4a   : > { %317 = vst.msk [vmem:[#allocation3 + $0x60] sm:$0xff] %vm288_vm1, %v2027_v12  ;;  %318 = vst.msk [vmem:[#allocation3 + $0x68] sm:$0xff] %vm288_vm1, %v2027_v12 }
  0x4b   : > { %319 = vst.msk [vmem:[#allocation3 + $0x70] sm:$0xff] %vm288_vm1, %v2027_v12  ;;  %320 = vst.msk [vmem:[#allocation3 + $0x78] sm:$0xff] %vm288_vm1, %v2027_v12 }
  0x4c PF: > { %v1807_v13 = vld [vmem:[%s2130_s26] sm:$0xff]   ;;  %v1808_v14 = vld [vmem:[%s2130_s26 + $0x8] sm:$0xff]   ;;  %v1809_v15 = vld [vmem:[%s2130_s26 + $0x10] sm:$0xff]   ;;  %vm409_vm2 = vcmask 523264   ;;  %v2028_v25 = vmov 0.0|0.0   ;;  %vm2029_vm3 = vmmov 0   ;;  %v531_v27 = vstv %s2120_s9  ;;  %p1498_p2 = scmp.ne.s32.totalorder %s2009_s17, %s2005_s16 }
  0x4d   : > { %1566 = vmatprep.subr.bf16.mxu0 %v1807_v13  ;;  %v1811_v16 = vld [vmem:[%s2128_s23] sm:$0xff]   ;;  %v1812_v18 = vld [vmem:[%s2128_s23 + $0x8] sm:$0xff]   ;;  %v1813_v19 = vld [vmem:[%s2128_s23 + $0x10] sm:$0xff]   ;;  %v2030_v26 = vmov 0.0   ;;  %v2031_v57 = vmov 0   ;;  %s2256_s29 = sshra.s32 %s1475_s10, 7 }
  0x4e   : > { %1567 = vmatpush3.bf16.msra.mxu0 %v1807_v13  ;;  %1574 = vmatprep.mubr.msk.bf16.mxu0 %vm409_vm2, %v1811_v16  ;;  %v1810_v17 = vld [vmem:[%s2130_s26 + $0x18] sm:$0xff]   ;;  %v1816_v22 = vld [vmem:[%s2128_s23 + $0x28] sm:$0xff]   ;;  %v1817_v23 = vld [vmem:[%s2128_s23 + $0x30] sm:$0xff]   ;;  %s1016_s30 = scalar_lea.vmem [#allocation4], %s2256_s29  ;;  %s1018_s4 = scalar_lea.vmem [#allocation5], %s2256_s29  ;;  %vm981_vm5 = vcmask 7168  }
  0x4f   : > { %1568 = vmatprep.subr.bf16.mxu0 %v1808_v14  ;;  %v1814_v20 = vld [vmem:[%s2128_s23 + $0x18] sm:$0xff]   ;;  %v1815_v21 = vld [vmem:[%s2128_s23 + $0x20] sm:$0xff]   ;;  %1806 = vset.pattern.permute.xlu1 %v2031_v57  ;;  %s1232_s5 = sld [smem:[#allocation6]] (!%p1498_p2) }
  0x50   : > { %v1818_v24 = vld [vmem:[%s2128_s23 + $0x38] sm:$0xff]   ;;  %1805 = vset.pattern.permute.xlu0 %v2031_v57 }
  0x52   : > { %1569 = vmatpush3.bf16.msra.mxu0 %v1808_v14  ;;  %v2765_v14 = vlaneseq }
  0x53   : > { %1570 = vmatprep.subr.bf16.mxu0 %v1809_v15 }
  0x54   : > { %vm2264_vm4 = vcmp.lt.s32.totalorder %v2765_v14, 128 }
  0x56   : > { %1571 = vmatpush3.bf16.msra.mxu0 %v1809_v15 }
  0x57   : > { %1572 = vmatprep.subr.bf16.mxu0 %v1810_v17 }
  0x5a   : > { %1573 = vmatpush3.bf16.msra.mxu0 %v1810_v17  ;;  %v2259_v17 = vshrl.u32 %v2765_v14, 7 }
  0x5b   : > { %1697 = vmatprep.subr.bf16.mxu0 %v2028_v25 }
  0x5c   : > { %2775 = vst [vmem:[#allocation15_spill] sm:$0xff] %v2259_v17 }
  0x5d   : > { %1575 = vmatmul.mubr.msk.bf16.vlgmr.msra.gmra.mrb[0].mxu0 %vm409_vm2, %v1812_v18 }
  0x5e   : > { %1578 = vmatprep.mubr.msk.bf16.mxu0 %vm409_vm2, %v1813_v19  ;;  %v1017_v19 = vld [vmem:[%s1016_s30] sm:$0x1] }
  0x65   : > { %1579 = vmatmul.mubr.msk.bf16.gmra.mrb[4].mxu0 %vm409_vm2, %v1814_v20 }
  0x66   : > { %1582 = vmatprep.mubr.msk.bf16.mxu0 %vm409_vm2, %v1815_v21  ;;  %v1045_v21 = vsub.s32 0, %v2259_v17 }
  0x6d   : > { %1583 = vmatmul.mubr.msk.bf16.gmra.mrb[8].mxu0 %vm409_vm2, %v1816_v22 }
  0x6e   : > { %1586 = vmatprep.mubr.msk.bf16.mxu0 %vm409_vm2, %v1817_v23 }
  0x75   : > { %1587 = vmatmul.mubr.msk.bf16.gmra.mrb[12].mxu0 %vm409_vm2, %v1818_v24 }
  0x76   : > { %1678 = vmatprep.mubr.msk.f32.mxu0 %vm2029_vm3, %v2030_v26 }
 0x130   : > { %v1576_v28 = vpop.f32.mrb[0].mxu0 }
 0x131   : > { %v2190_v29 = vmul.f32 %v1576_v28, %v531_v27  ;;  %v468_v30 = vpop.f32.mrb[1].mxu0 }
 0x132   : > { %v2192_v31 = vmul.f32 %v531_v27, %v468_v30  ;;  %v1577_v32 = vpop.f32.mrb[2].mxu0 }
 0x133   : > { %2772 = vst [vmem:[#allocation12_spill] sm:$0xff] %v2190_v29  ;;  %584 = vmax.xlane.f32.xlu1 %v2190_v29  ;;  %v471_v33 = vpop.f32.mrb[3].mxu0  ;;  %v2196_v34 = vmul.f32 %v1577_v32, %v531_v27 }
 0x134   : > { %2773 = vst [vmem:[#allocation13_spill] sm:$0xff] %v2192_v31  ;;  %580 = vmax.xlane.f32.xlu0 %v2192_v31  ;;  %v2198_v35 = vmul.f32 %v531_v27, %v471_v33 }
 0x137   : > { %586 = vmax.xlane.f32.xlu1 %v2196_v34 }
 0x138   : > { %582 = vmax.xlane.f32.xlu0 %v2198_v35  ;;  %v1580_v36 = vpop.f32.mrb[4].mxu0 }
 0x139   : > { %v484_v37 = vpop.f32.mrb[5].mxu0  ;;  %v2207_v42 = vmul.f32 %v1580_v36, %v531_v27 }
 0x13a   : > { %v2202_v38 = vmul.f32 %v531_v27, %v484_v37  ;;  %v1581_v39 = vpop.f32.mrb[6].mxu0 }
 0x13b   : > { %v487_v40 = vpop.f32.mrb[7].mxu0  ;;  %v2210_v43 = vmul.f32 %v1581_v39, %v531_v27  ;;  %v1022_v53 = vmax.f32 %v2190_v29, %v2207_v42 }
 0x13c   : > { %v2204_v41 = vmul.f32 %v531_v27, %v487_v40  ;;  %588 = vmax.xlane.f32.xlu0 %v2202_v38  ;;  %v1020_v58 = vmax.f32 %v2192_v31, %v2202_v38 }
 0x13d   : > { %v1023_v54 = vmax.f32 %v2196_v34, %v2210_v43 }
 0x13e   : > { %590 = vmax.xlane.f32.xlu1 %v2204_v41  ;;  %v1021_v59 = vmax.f32 %v2198_v35, %v2204_v41 }
 0x140   : > { %592 = vmax.xlane.f32.xlu0 %v2207_v42  ;;  %v1584_v44 = vpop.f32.mrb[8].mxu0 }
 0x141   : > { %v500_v45 = vpop.f32.mrb[9].mxu0  ;;  %v2219_v50 = vmul.f32 %v1584_v44, %v531_v27 }
 0x142   : > { %v2213_v46 = vmul.f32 %v531_v27, %v500_v45  ;;  %594 = vmax.xlane.f32.xlu1 %v2210_v43  ;;  %v1585_v47 = vpop.f32.mrb[10].mxu0 }
 0x143   : > { %v503_v48 = vpop.f32.mrb[11].mxu0  ;;  %v2222_v51 = vmul.f32 %v1585_v47, %v531_v27  ;;  %v1026_v62 = vmax.f32 %v1022_v53, %v2219_v50 }
 0x144   : > { %v2216_v49 = vmul.f32 %v531_v27, %v503_v48  ;;  %596 = vmax.xlane.f32.xlu0 %v2213_v46  ;;  %v1024_v2 = vmax.f32 %v1020_v58, %v2213_v46 }
 0x145   : > { %v1027_v63 = vmax.f32 %v1023_v54, %v2222_v51  ;;  %v2032_v54 = vmov 1.0|1.0  }
 0x146   : > { %2774 = vst [vmem:[#allocation14_spill] sm:$0xff] %v2216_v49  ;;  %598 = vmax.xlane.f32.xlu1 %v2216_v49  ;;  %v1025_v3 = vmax.f32 %v1021_v59, %v2216_v49  ;;  %1681 = vmatprep.subr.bf16.mxu1 %v2032_v54 }
 0x147   : > { %1682 = vmatpush3.bf16.msra.mxu1 %v2032_v54 }
 0x148   : > { %v1588_v52 = vpop.f32.mrb[12].mxu0  ;;  %600 = vmax.xlane.f32.xlu0 %v2219_v50  ;;  %1683 = vmatprep.subr.bf16.mxu1 %v2032_v54 }
 0x149   : > { %v2229_v55 = vmul.f32 %v1588_v52, %v531_v27  ;;  %v516_v56 = vpop.f32.mrb[13].mxu0 }
 0x14a   : > { %v2235_v60 = vmul.f32 %v531_v27, %v516_v56  ;;  %602 = vmax.xlane.f32.xlu1 %v2222_v51  ;;  %v1589_v61 = vpop.f32.mrb[14].mxu0 }
 0x14b   : > { %v2240_v0 = vmul.f32 %v1589_v61, %v531_v27  ;;  %v519_v1 = vpop.f32.mrb[15].mxu0  ;;  %v1030_v5 = vmax.f32 %v1026_v62, %v2229_v55  ;;  %1684 = vmatpush3.bf16.msra.mxu1 %v2032_v54 }
 0x14c   : > { %v2244_v4 = vmul.f32 %v531_v27, %v519_v1  ;;  %604 = vmax.xlane.f32.xlu0 %v2235_v60  ;;  %v1028_v7 = vmax.f32 %v1024_v2, %v2235_v60  ;;  %1685 = vmatprep.subr.bf16.mxu1 %v2032_v54 }
 0x14d   : > { %v1031_v6 = vmax.f32 %v1027_v63, %v2240_v0 }
 0x14e   : > { %v1029_v8 = vmax.f32 %v1025_v3, %v2244_v4  ;;  %606 = vmax.xlane.f32.xlu1 %v2244_v4 }
 0x14f   : > { %v1033_v9 = vmax.f32 %v1030_v5, %v1031_v6  ;;  %1686 = vmatpush3.bf16.msra.mxu1 %v2032_v54 }
 0x150   : > { %v1032_v10 = vmax.f32 %v1028_v7, %v1029_v8  ;;  %608 = vmax.xlane.f32.xlu0 %v2229_v55  ;;  %1687 = vmatprep.subr.bf16.mxu1 %v2032_v54 }
 0x152   : > { %v1034_v11 = vmax.f32 %v1032_v10, %v1033_v9  ;;  %610 = vmax.xlane.f32.xlu1 %v2240_v0 }
 0x153   : > { %1688 = vmatpush3.bf16.msra.mxu1 %v2032_v54 }
 0x154   : > { %v1035_v12 = vrot.slane %v1034_v11, 4  ;;  %1689 = vmatprep.subr.bf16.mxu1 %v2032_v54 }
 0x156   : > { %v1036_v13 = vmax.f32 %v1034_v11, %v1035_v12 }
 0x157   : > { %1690 = vmatpush3.bf16.msra.mxu1 %v2032_v54 }
 0x158   : > { %v1037_v15 = vrot.slane %v1036_v13, 2  ;;  %1691 = vmatprep.subr.bf16.mxu1 %v2032_v54 }
 0x15a   : > { %v1038_v16 = vmax.f32 %v1036_v13, %v1037_v15 }
 0x15b   : > { %1692 = vmatpush3.bf16.msra.mxu1 %v2032_v54 }
 0x15c   : > { %v1039_v18 = vrot.slane %v1038_v16, 1  ;;  %1693 = vmatprep.subr.bf16.mxu1 %v2032_v54 }
 0x15e   : > { %v1040_v20 = vmax.f32 %v1038_v16, %v1039_v18 }
 0x15f   : > { %1694 = vmatpush3.bf16.msra.mxu1 %v2032_v54 }
 0x160   : > { %v2268_v23 = vmax.f32 %v1017_v19, %v1040_v20  ;;  %1695 = vmatprep.subr.bf16.mxu1 %v2032_v54 }
 0x162   : > { %2778 = vst [vmem:[#allocation16_spill] sm:$0xff] %v2268_v23  ;;  %v2271_v24 = vrot.slane %v2268_v23, %v1045_v21  ;;  %v1166_v26 = vsub.f32 %v1017_v19, %v2268_v23  ;;  %1175 = vst.msk [vmem:[%s1016_s30] sm:$0x1] %vm2264_vm4, %v2268_v23 }
 0x163   : > { %1696 = vmatpush3.bf16.msra.mxu1 %v2032_v54 }
 0x164   : > { %v1048_v27 = vsub.f32 %v2192_v31, %v2271_v24  ;;  %v1049_v28 = vsub.f32 %v2198_v35, %v2271_v24  ;;  %v1050_v30 = vsub.f32 %v2190_v29, %v2271_v24  ;;  %v1051_v32 = vsub.f32 %v2196_v34, %v2271_v24 }
 0x165   : > { %v1052_v39 = vsub.f32 %v2202_v38, %v2271_v24  ;;  %v1053_v44 = vsub.f32 %v2204_v41, %v2271_v24  ;;  %v1054_v47 = vsub.f32 %v2207_v42, %v2271_v24  ;;  %v1055_v52 = vsub.f32 %v2210_v43, %v2271_v24 }
 0x166   : > { %v1064_v33 = vmul.f32 1.442695, %v1048_v27  ;;  %v1066_v36 = vmul.f32 1.442695, %v1049_v28  ;;  %v1068_v37 = vmul.f32 1.442695, %v1050_v30  ;;  %v1056_v53 = vsub.f32 %v2213_v46, %v2271_v24 }
 0x167   : > { %v1070_v40 = vmul.f32 1.442695, %v1051_v32  ;;  %v1072_v45 = vmul.f32 1.442695, %v1052_v39  ;;  %v1074_v48 = vmul.f32 1.442695, %v1053_v44  ;;  %v1057_v57 = vsub.f32 %v2216_v49, %v2271_v24 }
 0x168   : > { %1819 = vpow2.f32 %v1064_v33  ;;  %v1076_v56 = vmul.f32 1.442695, %v1054_v47  ;;  %v1078_v58 = vmul.f32 1.442695, %v1055_v52  ;;  %v1080_v59 = vmul.f32 1.442695, %v1056_v53 }
 0x169   : > { %1821 = vpow2.f32 %v1066_v36  ;;  %v1082_v62 = vmul.f32 1.442695, %v1057_v57  ;;  %v1058_v63 = vsub.f32 %v2219_v50, %v2271_v24  ;;  %v1059_v2 = vsub.f32 %v2222_v51, %v2271_v24 }
 0x16a   : > { %1823 = vpow2.f32 %v1068_v37  ;;  %v1167_v3 = vmul.f32 1.442695, %v1166_v26  ;;  %v1061_v8 = vsub.f32 %v2244_v4, %v2271_v24  ;;  %v1060_v11 = vsub.f32 %v2235_v60, %v2271_v24 }
 0x16b   : > { %1825 = vpow2.f32 %v1070_v40  ;;  %v1084_v9 = vmul.f32 1.442695, %v1058_v63  ;;  %v1086_v10 = vmul.f32 1.442695, %v1059_v2  ;;  %v1062_v18 = vsub.f32 %v2229_v55, %v2271_v24 }
 0x16c   : > { %1827 = vpow2.f32 %v1072_v45  ;;  %v1090_v16 = vmul.f32 1.442695, %v1061_v8  ;;  %v1088_v19 = vmul.f32 1.442695, %v1060_v11  ;;  %v1063_v20 = vsub.f32 %v2240_v0, %v2271_v24  ;;  %v1019_v24 = vld [vmem:[%s1018_s4] sm:$0x1] }
 0x16d   : > { %1829 = vpow2.f32 %v1074_v48  ;;  %v1092_v28 = vmul.f32 1.442695, %v1062_v18 }
 0x16e   : > { %1831 = vpow2.f32 %v1076_v56  ;;  %v1094_v32 = vmul.f32 1.442695, %v1063_v20  ;;  %v2384_v20 = vld [vmem:[#allocation2 + $0x30] sm:$0xff] }
 0x16f   : > { %1833 = vpow2.f32 %v1078_v58 }
 0x170   : > { %1835 = vpow2.f32 %v1080_v59  ;;  %v2033_v59 = vmov 1.0  }
 0x171   : > { %1837 = vpow2.f32 %v1082_v62  ;;  %v2339_v62 = vld [vmem:[#allocation2] sm:$0xff] }
 0x172   : > { %v1820_v61 = vpop.eup %1819  ;;  %1839 = vpow2.f32 %v1167_v3  ;;  %v2347_v3 = vld [vmem:[#allocation2 + $0x18] sm:$0xff] }
 0x173   : > { %v1822_v1 = vpop.eup %1821  ;;  %1841 = vpow2.f32 %v1084_v9 }
 0x174   : > { %v1824_v5 = vpop.eup %1823  ;;  %v1698_v6 = vpack.c.bf16 %v1822_v1, %v1820_v61  ;;  %1843 = vpow2.f32 %v1086_v10  ;;  %v2337_v61 = vld [vmem:[#allocation2 + $0x10] sm:$0xff] }
 0x175   : > { %v1826_v7 = vpop.eup %1825  ;;  %1845 = vpow2.f32 %v1090_v16  ;;  %v2378_v16 = vld [vmem:[#allocation2 + $0x28] sm:$0xff] }
 0x176   : > { %1699 = vmatpush3.bf16.msra.mxu0 %v1698_v6  ;;  %v1828_v12 = vpop.eup %1827  ;;  %v1701_v13 = vpack.c.bf16 %v1826_v7, %v1824_v5  ;;  %1847 = vpow2.f32 %v1088_v19  ;;  %v2354_v5 = vld [vmem:[#allocation2 + $0x8] sm:$0xff] }
 0x177   : > { %1700 = vmatprep.subr.bf16.mxu0 %v2028_v25  ;;  %v1830_v15 = vpop.eup %1829  ;;  %1849 = vpow2.f32 %v1092_v28  ;;  %v2393_v28 = vld [vmem:[#allocation2 + $0x38] sm:$0xff] }
 0x178   : > { %v1832_v21 = vpop.eup %1831  ;;  %v1704_v26 = vpack.c.bf16 %v1830_v15, %v1828_v12  ;;  %1851 = vpow2.f32 %v1094_v32  ;;  %v2372_v12 = vld [vmem:[#allocation2 + $0x20] sm:$0xff] }
 0x179   : > { %v1834_v27 = vpop.eup %1833 }
 0x17a   : > { %1702 = vmatpush3.bf16.msra.mxu0 %v1701_v13  ;;  %v1836_v30 = vpop.eup %1835  ;;  %v1707_v36 = vpack.c.bf16 %v1834_v27, %v1832_v21 }
 0x17b   : > { %1703 = vmatprep.subr.bf16.mxu0 %v2028_v25  ;;  %v1838_v33 = vpop.eup %1837 }
 0x17c   : > { %v1840_v37 = vpop.eup %1839  ;;  %v1710_v44 = vpack.c.bf16 %v1838_v33, %v1836_v30  ;;  %v2402_v33 = vld [vmem:[#allocation2 + $0x40] sm:$0xff] }
 0x17d   : > { %v2327_v39 = vmul.f32 %v1840_v37, %v1019_v24  ;;  %v1842_v40 = vpop.eup %1841 }
 0x17e   : > { %1705 = vmatpush3.bf16.msra.mxu0 %v1704_v26  ;;  %v1844_v45 = vpop.eup %1843 }
 0x17f   : > { %1706 = vmatprep.subr.bf16.mxu0 %v2028_v25  ;;  %v1846_v47 = vpop.eup %1845  ;;  %v1713_v48 = vpack.c.bf16 %v1844_v45, %v1842_v40  ;;  %v2412_v40 = vld [vmem:[#allocation2 + $0x48] sm:$0xff] }
 0x180   : > { %v1848_v52 = vpop.eup %1847 }
 0x181   : > { %v1850_v53 = vpop.eup %1849  ;;  %v1716_v56 = vpack.c.bf16 %v1846_v47, %v1848_v52  ;;  %v2421_v52 = vld [vmem:[#allocation2 + $0x50] sm:$0xff] }
 0x182   : > { %1708 = vmatpush3.bf16.msra.mxu0 %v1707_v36  ;;  %v1852_v57 = vpop.eup %1851 }
 0x183   : > { %1709 = vmatprep.subr.bf16.mxu0 %v2028_v25  ;;  %v1719_v58 = vpack.c.bf16 %v1852_v57, %v1850_v53  ;;  %v2431_v57 = vld [vmem:[#allocation2 + $0x58] sm:$0xff] }
 0x186   : > { %1711 = vmatpush3.bf16.msra.mxu0 %v1710_v44 }
 0x187   : > { %1712 = vmatprep.subr.bf16.mxu0 %v2028_v25 }
 0x18a   : > { %1714 = vmatpush3.bf16.msra.mxu0 %v1713_v48 }
 0x18b   : > { %1715 = vmatprep.subr.bf16.mxu0 %v2028_v25 }
 0x18e   : > { %1717 = vmatpush3.bf16.msra.mxu0 %v1716_v56 }
 0x18f   : > { %1718 = vmatprep.subr.bf16.mxu0 %v2028_v25 }
 0x192   : > { %1720 = vmatpush3.bf16.msra.mxu0 %v1719_v58 }
 0x195   : > { %1679 = vmatmul.mubr.f32.vlgmr.msra.gmra.mrb[16].mxu0 %v2033_v59 }
 0x1c0   : > { %v585_v63 = vpop.xlane.xlu1 %584 }
 0x1c1   : > { %v2342_v54 = vmax.f32 %v2337_v61, %v585_v63  ;;  %v581_v1 = vpop.xlane.xlu0 %580 }
 0x1c2   : > { %v2345_v2 = vmax.f32 %v2339_v62, %v581_v1 }
 0x1c3   : > { %984 = vst.msk [vmem:[#allocation2 + $0x10] sm:$0xff] %vm981_vm5, %v2342_v54  ;;  %640 = vperm.xlu1 %1806, %v2342_v54  }
 0x1c4   : > { %982 = vst.msk [vmem:[#allocation2] sm:$0xff] %vm981_vm5, %v2345_v2  ;;  %v587_v7 = vpop.xlane.xlu1 %586  ;;  %630 = vperm.xlu0 %1805, %v2345_v2  }
 0x1c5   : > { %v2362_v8 = vmax.f32 %v2347_v3, %v587_v7  ;;  %v583_v9 = vpop.xlane.xlu0 %582  ;;  %v2441_v7 = vld [vmem:[#allocation2 + $0x60] sm:$0xff] }
 0x1c6   : > { %v2365_v10 = vmax.f32 %v2354_v5, %v583_v9 }
 0x1c7   : > { %985 = vst.msk [vmem:[#allocation2 + $0x18] sm:$0xff] %vm981_vm5, %v2362_v8  ;;  %645 = vperm.xlu1 %1806, %v2362_v8  }
 0x1c8   : > { %983 = vst.msk [vmem:[#allocation2 + $0x8] sm:$0xff] %vm981_vm5, %v2365_v10 }
 0x1c9   : > { %v589_v15 = vpop.xlane.xlu0 %588 }
 0x1ca   : > { %v2381_v18 = vmax.f32 %v2372_v12, %v589_v15  ;;  %v2471_v15 = vld [vmem:[#allocation2 + $0x78] sm:$0xff] }
 0x1cb   : > { %v591_v19 = vpop.xlane.xlu1 %590  ;;  %635 = vperm.xlu1 %1806, %v2365_v10  }
 0x1cc   : > { %986 = vst.msk [vmem:[#allocation2 + $0x20] sm:$0xff] %vm981_vm5, %v2381_v18  ;;  %v2391_v26 = vmax.f32 %v2378_v16, %v591_v19  ;;  %v2451_v19 = vld [vmem:[#allocation2 + $0x68] sm:$0xff] }
 0x1cd   : > { %v593_v27 = vpop.xlane.xlu0 %592 }
 0x1ce   : > { %987 = vst.msk [vmem:[#allocation2 + $0x28] sm:$0xff] %vm981_vm5, %v2391_v26  ;;  %v2400_v32 = vmax.f32 %v2384_v20, %v593_v27 }
 0x1cf   : > { %v595_v24 = vpop.xlane.xlu1 %594 }
 0x1d0   : > { %988 = vst.msk [vmem:[#allocation2 + $0x30] sm:$0xff] %vm981_vm5, %v2400_v32  ;;  %v2409_v37 = vmax.f32 %v2393_v28, %v595_v24  ;;  %660 = vperm.xlu1 %1806, %v2400_v32  }
 0x1d1   : > { %v597_v44 = vpop.xlane.xlu0 %596 }
 0x1d2   : > { %989 = vst.msk [vmem:[#allocation2 + $0x38] sm:$0xff] %vm981_vm5, %v2409_v37  ;;  %v2419_v47 = vmax.f32 %v2402_v33, %v597_v44 }
 0x1d3   : > { %v599_v48 = vpop.xlane.xlu1 %598 }
 0x1d4   : > { %v2424_v53 = vmax.f32 %v2412_v40, %v599_v48  ;;  %650 = vperm.xlu1 %1806, %v2381_v18   ;;  %990 = vst.msk [vmem:[#allocation2 + $0x40] sm:$0xff] %vm981_vm5, %v2419_v47 }
 0x1d5   : > { %v601_v58 = vpop.xlane.xlu0 %600 }
 0x1d6   : > { %991 = vst.msk [vmem:[#allocation2 + $0x48] sm:$0xff] %vm981_vm5, %v2424_v53  ;;  %675 = vperm.xlu0 %1805, %v2424_v53   ;;  %v2439_v63 = vmax.f32 %v2421_v52, %v601_v58  ;;  %v2461_v58 = vld [vmem:[#allocation2 + $0x70] sm:$0xff] }
 0x1d7   : > { %v603_v1 = vpop.xlane.xlu1 %602 }
 0x1d8   : > { %v2444_v9 = vmax.f32 %v2431_v57, %v603_v1  ;;  %655 = vperm.xlu1 %1806, %v2391_v26   ;;  %992 = vst.msk [vmem:[#allocation2 + $0x50] sm:$0xff] %vm981_vm5, %v2439_v63 }
 0x1d9   : > { %v605_v27 = vpop.xlane.xlu0 %604 }
 0x1da   : > { %993 = vst.msk [vmem:[#allocation2 + $0x58] sm:$0xff] %vm981_vm5, %v2444_v9  ;;  %685 = vperm.xlu0 %1805, %v2444_v9   ;;  %v2459_v44 = vmax.f32 %v2441_v7, %v605_v27 }
 0x1db   : > { %v607_v48 = vpop.xlane.xlu1 %606 }
 0x1dc   : > { %v2464_v1 = vmax.f32 %v2451_v19, %v607_v48  ;;  %665 = vperm.xlu1 %1806, %v2409_v37   ;;  %994 = vst.msk [vmem:[#allocation2 + $0x60] sm:$0xff] %vm981_vm5, %v2459_v44 }
 0x1dd   : > { %v609_v24 = vpop.xlane.xlu0 %608 }
 0x1de   : > { %995 = vst.msk [vmem:[#allocation2 + $0x68] sm:$0xff] %vm981_vm5, %v2464_v1  ;;  %695 = vperm.xlu0 %1805, %v2464_v1   ;;  %v2479_v48 = vmax.f32 %v2461_v58, %v609_v24 }
 0x1df   : > { %v611_v56 = vpop.xlane.xlu1 %610 }
 0x1e0   : > { %v2482_v14 = vmax.f32 %v2471_v15, %v611_v56  ;;  %670 = vperm.xlu1 %1806, %v2419_v47   ;;  %996 = vst.msk [vmem:[#allocation2 + $0x70] sm:$0xff] %vm981_vm5, %v2479_v48 }
 0x1e2   : > { %997 = vst.msk [vmem:[#allocation2 + $0x78] sm:$0xff] %vm981_vm5, %v2482_v14  ;;  %705 = vperm.xlu0 %1805, %v2482_v14  }
 0x1e4   : > { %680 = vperm.xlu1 %1806, %v2439_v63  }
 0x1e8   : > { %690 = vperm.xlu1 %1806, %v2459_v44  }
 0x1ec   : > { %700 = vperm.xlu1 %1806, %v2479_v48  }
 0x242   : > { %v641_v56 = vpop.permute.xlu1 %640 }
 0x243   : > { %v631_v24 = vpop.permute.xlu0 %630  ;;  %v710_v21 = vsub.f32 %v2190_v29, %v641_v56 }
 0x244   : > { %v708_v59 = vsub.f32 %v2192_v31, %v631_v24 }
 0x245   : > { %v728_v11 = vmul.f32 1.442695, %v710_v21 }
 0x246   : > { %v724_v36 = vmul.f32 1.442695, %v708_v59  ;;  %v646_v45 = vpop.permute.xlu1 %645 }
 0x247   : > { %v711_v30 = vsub.f32 %v2196_v34, %v646_v45 }
 0x248   : > { %1853 = vpow2.f32 %v724_v36 }
 0x249   : > { %v730_v13 = vmul.f32 1.442695, %v711_v30 }
 0x24a   : > { %v636_v27 = vpop.permute.xlu1 %635 }
 0x24b   : > { %v709_v25 = vsub.f32 %v2198_v35, %v636_v27 }
 0x24d   : > { %v726_v6 = vmul.f32 1.442695, %v709_v25 }
 0x24f   : > { %1855 = vpow2.f32 %v726_v6  ;;  %v661_v23 = vpop.permute.xlu1 %660 }
 0x250   : > { %1857 = vpow2.f32 %v728_v11  ;;  %v714_v56 = vsub.f32 %v2207_v42, %v661_v23 }
 0x251   : > { %1859 = vpow2.f32 %v730_v13 }
 0x252   : > { %v1854_v17 = vpop.eup %1853  ;;  %v736_v25 = vmul.f32 1.442695, %v714_v56 }
 0x253   : > { %1622 = vmatprep.mubr.f32.mxu1 %v1854_v17  ;;  %v651_v24 = vpop.permute.xlu1 %650 }
 0x254   : > { %v712_v59 = vsub.f32 %v2202_v38, %v651_v24 }
 0x255   : > { %v676_v36 = vpop.permute.xlu0 %675 }
 0x256   : > { %v732_v29 = vmul.f32 1.442695, %v712_v59  ;;  %v717_v23 = vsub.f32 %v2216_v49, %v676_v36 }
 0x257   : > { %v656_v31 = vpop.permute.xlu1 %655 }
 0x258   : > { %1861 = vpow2.f32 %v732_v29  ;;  %v713_v45 = vsub.f32 %v2204_v41, %v656_v31  ;;  %v742_v56 = vmul.f32 1.442695, %v717_v23 }
 0x259   : > { %v1856_v21 = vpop.eup %1855  ;;  %v686_v27 = vpop.permute.xlu0 %685 }
 0x25a   : > { %v1858_v30 = vpop.eup %1857  ;;  %v734_v6 = vmul.f32 1.442695, %v713_v45  ;;  %1623 = vmatmul.mubr.f32.vlgmr.msra.gmra.mrb[0].mxu1 %v1856_v21  ;;  %v719_v45 = vsub.f32 %v2222_v51, %v686_v27 }
 0x25b   : > { %1625 = vmatprep.mubr.f32.mxu1 %v1858_v30  ;;  %v666_v11 = vpop.permute.xlu1 %665  ;;  %v1860_v13 = vpop.eup %1859 }
 0x25c   : > { %1863 = vpow2.f32 %v734_v6  ;;  %v715_v17 = vsub.f32 %v2210_v43, %v666_v11 }
 0x25d   : > { %1865 = vpow2.f32 %v736_v25  ;;  %v696_v31 = vpop.permute.xlu0 %695  ;;  %v746_v25 = vmul.f32 1.442695, %v719_v45 }
 0x25e   : > { %v738_v24 = vmul.f32 1.442695, %v715_v17  ;;  %1626 = vmatmul.mubr.f32.gmra.mrb[2].mxu1 %v1860_v13  ;;  %v721_v36 = vsub.f32 %v2244_v4, %v696_v31 }
 0x25f   : > { %v671_v29 = vpop.permute.xlu1 %670 }
 0x260   : > { %1867 = vpow2.f32 %v738_v24  ;;  %v716_v59 = vsub.f32 %v2213_v46, %v671_v29  ;;  %v750_v29 = vmul.f32 1.442695, %v721_v36 }
 0x261   : > { %v706_v13 = vpop.permute.xlu0 %705 }
 0x262   : > { %v1862_v21 = vpop.eup %1861  ;;  %v740_v30 = vmul.f32 1.442695, %v716_v59  ;;  %v723_v59 = vsub.f32 %v2240_v0, %v706_v13 }
 0x263   : > { %1628 = vmatprep.mubr.f32.mxu1 %v1862_v21  ;;  %v681_v6 = vpop.permute.xlu1 %680 }
 0x264   : > { %1869 = vpow2.f32 %v740_v30  ;;  %v718_v11 = vsub.f32 %v2219_v50, %v681_v6 }
 0x265   : > { %1871 = vpow2.f32 %v742_v56 }
 0x266   : > { %v1864_v17 = vpop.eup %1863  ;;  %v744_v24 = vmul.f32 1.442695, %v718_v11  ;;  %v754_v11 = vmul.f32 1.442695, %v723_v59 }
 0x267   : > { %v1866_v49 = vpop.eup %1865  ;;  %1629 = vmatmul.mubr.f32.gmra.mrb[4].mxu1 %v1864_v17  ;;  %v691_v23 = vpop.permute.xlu1 %690 }
 0x268   : > { %1873 = vpow2.f32 %v744_v24  ;;  %v720_v27 = vsub.f32 %v2235_v60, %v691_v23  ;;  %1631 = vmatprep.mubr.f32.mxu1 %v1866_v49  ;;  %v1162_v21 = vpop.f32.mrb[16].mxu0 }
 0x269   : > { %1875 = vpow2.f32 %v746_v25  ;;  %v2513_v31 = vadd.f32 %v2327_v39, %v1162_v21  ;;  %v1680_v30 = vpop.f32.mrb[17].mxu0  ;;  %v2780_v21 = vsub.f32 %v2339_v62, %v2345_v2  ;;  %v2784_v62 = vsub.f32 %v2372_v12, %v2381_v18 }
 0x26a   : > { %v1868_v56 = vpop.eup %1867  ;;  %v748_v45 = vmul.f32 1.442695, %v720_v27 }
 0x26b   : > { %1632 = vmatmul.mubr.f32.gmra.mrb[6].mxu1 %v1868_v56  ;;  %v701_v6 = vpop.permute.xlu1 %700  ;;  %1176 = vst.msk [vmem:[%s1018_s4] sm:$0x1] %vm2264_vm4, %v2513_v31  ;;  %v917_v56 = vmul.f32 1.442695, %v2780_v21 }
 0x26c   : > { %1877 = vpow2.f32 %v748_v45  ;;  %v722_v49 = vsub.f32 %v2229_v55, %v701_v6  ;;  %v2781_v45 = vsub.f32 %v2347_v3, %v2362_v8  ;;  %v2782_v6 = vsub.f32 %v2337_v61, %v2342_v54 }
 0x26d   : > { %1879 = vpow2.f32 %v750_v29  ;;  %v2779_v29 = vsub.f32 %v2354_v5, %v2365_v10  ;;  %v2783_v5 = vsub.f32 %v2378_v16, %v2391_v26  ;;  %v2785_v61 = vsub.f32 %v2393_v28, %v2409_v37 }
 0x26e   : > { %v1870_v25 = vpop.eup %1869  ;;  %v752_v36 = vmul.f32 1.442695, %v722_v49  ;;  %v923_v30 = vmul.f32 1.442695, %v2781_v45  ;;  %v921_v49 = vmul.f32 1.442695, %v2782_v6  ;;  %v2786_v16 = vsub.f32 %v2384_v20, %v2400_v32 }
 0x26f   : > { %v1872_v17 = vpop.eup %1871  ;;  %1634 = vmatprep.mubr.f32.mxu1 %v1870_v25  ;;  %v919_v59 = vmul.f32 1.442695, %v2779_v29  ;;  %v566_v45 = vld [vmem:[#allocation3 + $0x10] sm:$0xff]  ;;  %v2787_v20 = vsub.f32 %v2412_v40, %v2424_v53  ;;  %v2789_v40 = vsub.f32 %v2431_v57, %v2444_v9 }
 0x270   : > { %1881 = vpow2.f32 %v752_v36  ;;  %1635 = vmatmul.mubr.f32.gmra.mrb[8].mxu1 %v1872_v17  ;;  %v925_v36 = vmul.f32 1.442695, %v2784_v62  ;;  %v565_v17 = vld [vmem:[#allocation3 + $0x8] sm:$0xff] }
 0x271   : > { %1883 = vpow2.f32 %v754_v11  ;;  %v927_v11 = vmul.f32 1.442695, %v2783_v5  ;;  %v935_v6 = vmul.f32 1.442695, %v2787_v20 }
 0x272   : > { %v1874_v39 = vpop.eup %1873  ;;  %1885 = vpow2.f32 %v919_v59  ;;  %v567_v59 = vld [vmem:[#allocation3 + $0x18] sm:$0xff] }
 0x273   : > { %v1876_v13 = vpop.eup %1875  ;;  %1637 = vmatprep.mubr.f32.mxu1 %v1874_v39  ;;  %1887 = vpow2.f32 %v917_v56  ;;  %v564_v39 = vld [vmem:[#allocation3] sm:$0xff] }
 0x274   : > { %1638 = vmatmul.mubr.f32.gmra.mrb[10].mxu1 %v1876_v13  ;;  %1889 = vpow2.f32 %v923_v30  ;;  %v931_v13 = vmul.f32 1.442695, %v2785_v61 }
 0x275   : > { %1891 = vpow2.f32 %v921_v49 }
 0x276   : > { %v1878_v24 = vpop.eup %1877  ;;  %1893 = vpow2.f32 %v927_v11  ;;  %v2788_v11 = vsub.f32 %v2402_v33, %v2419_v47  ;;  %v2790_v33 = vsub.f32 %v2421_v52, %v2439_v63 }
 0x277   : > { %v1880_v23 = vpop.eup %1879  ;;  %1640 = vmatprep.mubr.f32.mxu1 %v1878_v24  ;;  %1895 = vpow2.f32 %v925_v36 }
 0x278   : > { %1641 = vmatmul.mubr.f32.gmra.mrb[12].mxu1 %v1880_v23  ;;  %1897 = vpow2.f32 %v931_v13  ;;  %v937_v61 = vmul.f32 1.442695, %v2790_v33  ;;  %v569_v13 = vld [vmem:[#allocation3 + $0x28] sm:$0xff] }
 0x27a   : > { %v1882_v22 = vpop.eup %1881 }
 0x27b   : > { %v1884_v27 = vpop.eup %1883  ;;  %1643 = vmatprep.mubr.f32.mxu1 %v1882_v22  ;;  %v929_v22 = vmul.f32 1.442695, %v2786_v16  ;;  %v2791_v16 = vsub.f32 %v2451_v19, %v2464_v1  ;;  %v2793_v19 = vsub.f32 %v2471_v15, %v2482_v14  ;;  %v573_v15 = vld [vmem:[#allocation3 + $0x48] sm:$0xff] }
 0x27c   : > { %1644 = vmatmul.mubr.f32.gmra.mrb[14].mxu1 %v1884_v27  ;;  %v1886_v25 = vpop.eup %1885 }
 0x27d   : > { %v1888_v3 = vpop.eup %1887  ;;  %v950_v24 = vmul.f32 %v1886_v25, %v565_v17  ;;  %1899 = vpow2.f32 %v929_v22  ;;  %v933_v25 = vmul.f32 1.442695, %v2788_v11  ;;  %v943_v22 = vmul.f32 1.442695, %v2791_v16 }
 0x27e   : > { %v1890_v23 = vpop.eup %1889  ;;  %v949_v29 = vmul.f32 %v1888_v3, %v564_v39  ;;  %1901 = vpow2.f32 %v935_v6  ;;  %v939_v3 = vmul.f32 1.442695, %v2789_v40  ;;  %v570_v6 = vld [vmem:[#allocation3 + $0x30] sm:$0xff]  ;;  %v2794_v11 = vsub.f32 %v2461_v58, %v2479_v48 }
 0x27f   : > { %v1892_v12 = vpop.eup %1891  ;;  %v952_v28 = vmul.f32 %v1890_v23, %v567_v59  ;;  %1903 = vpow2.f32 %v933_v25  ;;  %v568_v23 = vld [vmem:[#allocation3 + $0x20] sm:$0xff] }
 0x280   : > { %v951_v5 = vmul.f32 %v1892_v12, %v566_v45  ;;  %v1894_v39 = vpop.eup %1893  ;;  %1905 = vpow2.f32 %v939_v3  ;;  %v571_v45 = vld [vmem:[#allocation3 + $0x38] sm:$0xff]  ;;  %v945_v25 = vmul.f32 1.442695, %v2794_v11 }
 0x281   : > { %1907 = vpow2.f32 %v937_v61 }
 0x282   : > { %1909 = vpow2.f32 %v943_v22 }
 0x32d   : > { %v1624_v27 = vpop.f32.mrb[0].mxu1 }
 0x32e   : > { %v2545_v21 = vadd.f32 %v1624_v27, %v950_v24  ;;  %v822_v56 = vpop.f32.mrb[1].mxu1  ;;  %v1896_v24 = vpop.eup %1895  ;;  %v954_v27 = vmul.f32 %v1894_v39, %v569_v13 }
 0x32f   : > { %v2547_v30 = vadd.f32 %v949_v29, %v822_v56  ;;  %v1898_v57 = vpop.eup %1897  ;;  %v2792_v29 = vsub.f32 %v2441_v7, %v2459_v44  ;;  %v953_v56 = vmul.f32 %v1896_v24, %v568_v23  ;;  %v572_v24 = vld [vmem:[#allocation3 + $0x40] sm:$0xff] }
 0x330   : > { %999 = vst.msk [vmem:[#allocation3 + $0x8] sm:$0xff] %vm981_vm5, %v2545_v21  ;;  %v1900_v52 = vpop.eup %1899  ;;  %v956_v7 = vmul.f32 %v1898_v57, %v571_v45 }
 0x331   : > { %998 = vst.msk [vmem:[#allocation3] sm:$0xff] %vm981_vm5, %v2547_v30  ;;  %v1627_v49 = vpop.f32.mrb[2].mxu1  ;;  %v941_v59 = vmul.f32 1.442695, %v2792_v29  ;;  %v955_v40 = vmul.f32 %v1900_v52, %v570_v6  ;;  %v1902_v3 = vpop.eup %1901 }
 0x332   : > { %v2559_v62 = vadd.f32 %v1627_v49, %v952_v28  ;;  %v832_v36 = vpop.f32.mrb[3].mxu1  ;;  %v1904_v61 = vpop.eup %1903  ;;  %v958_v58 = vmul.f32 %v1902_v3, %v573_v15 }
 0x333   : > { %v2561_v17 = vadd.f32 %v951_v5, %v832_v36  ;;  %v947_v5 = vmul.f32 1.442695, %v2793_v19  ;;  %1911 = vpow2.f32 %v941_v59  ;;  %v1906_v23 = vpop.eup %1905  ;;  %v957_v22 = vmul.f32 %v1904_v61, %v572_v24  ;;  %v577_v19 = vld [vmem:[#allocation3 + $0x68] sm:$0xff]  ;;  %v579_v61 = vld [vmem:[#allocation3 + $0x78] sm:$0xff] }
 0x334   : > { %1001 = vst.msk [vmem:[#allocation3 + $0x18] sm:$0xff] %vm981_vm5, %v2559_v62  ;;  %v1908_v57 = vpop.eup %1907 }
 0x335   : > { %1000 = vst.msk [vmem:[#allocation3 + $0x10] sm:$0xff] %vm981_vm5, %v2561_v17  ;;  %1913 = vpow2.f32 %v947_v5  ;;  %v1910_v52 = vpop.eup %1909 }
 0x336   : > { %1915 = vpow2.f32 %v945_v25  ;;  %v576_v25 = vld [vmem:[#allocation3 + $0x60] sm:$0xff] }
 0x33a   : > { %v1630_v12 = vpop.f32.mrb[4].mxu1 }
 0x33b   : > { %v2579_v28 = vadd.f32 %v1630_v12, %v954_v27  ;;  %v842_v20 = vpop.f32.mrb[5].mxu1  ;;  %v575_v27 = vld [vmem:[#allocation3 + $0x58] sm:$0xff]  ;;  %v574_v12 = vld [vmem:[#allocation3 + $0x50] sm:$0xff] }
 0x33c   : > { %v2581_v49 = vadd.f32 %v953_v56, %v842_v20  ;;  %v960_v45 = vmul.f32 %v1906_v23, %v575_v27  ;;  %v959_v6 = vmul.f32 %v1908_v57, %v574_v12 }
 0x33d   : > { %1003 = vst.msk [vmem:[#allocation3 + $0x28] sm:$0xff] %vm981_vm5, %v2579_v28  ;;  %v1912_v5 = vpop.eup %1911 }
 0x33e   : > { %1002 = vst.msk [vmem:[#allocation3 + $0x20] sm:$0xff] %vm981_vm5, %v2581_v49  ;;  %v1633_v36 = vpop.f32.mrb[6].mxu1  ;;  %v961_v15 = vmul.f32 %v1912_v5, %v576_v25 }
 0x33f   : > { %v2593_v39 = vadd.f32 %v1633_v36, %v956_v7  ;;  %v852_v33 = vpop.f32.mrb[7].mxu1  ;;  %v1914_v3 = vpop.eup %1913 }
 0x340   : > { %v2595_v13 = vadd.f32 %v955_v40, %v852_v33  ;;  %v962_v40 = vmul.f32 %v1910_v52, %v577_v19  ;;  %v1916_v24 = vpop.eup %1915  ;;  %v964_v27 = vmul.f32 %v1914_v3, %v579_v61  ;;  %v2796_v19 = vlaneseq (!%p1498_p2)  ;;  %v2797_v3 = vld [vmem:[#allocation13_spill] sm:$0xff] (!%p1498_p2) }
 0x341   : > { %1005 = vst.msk [vmem:[#allocation3 + $0x38] sm:$0xff] %vm981_vm5, %v2593_v39 }
 0x342   : > { %1004 = vst.msk [vmem:[#allocation3 + $0x30] sm:$0xff] %vm981_vm5, %v2595_v13  ;;  %v1199_v5 = vand.u32 (!%p1498_p2), 127, %v2796_v19 }
 0x343   : > { %v1636_v16 = vpop.f32.mrb[8].mxu1 }
 0x344   : > { %v2601_v29 = vadd.f32 %v1636_v16, %v958_v58  ;;  %v862_v59 = vpop.f32.mrb[9].mxu1  ;;  %v578_v16 = vld [vmem:[#allocation3 + $0x70] sm:$0xff] }
 0x345   : > { %v2603_v56 = vadd.f32 %v957_v22, %v862_v59  ;;  %v963_v59 = vmul.f32 %v1916_v24, %v578_v16  ;;  %v2798_v24 = vld [vmem:[#allocation12_spill] sm:$0xff] (!%p1498_p2) }
 0x346   : > { %1007 = vst.msk [vmem:[#allocation3 + $0x48] sm:$0xff] %vm981_vm5, %v2601_v29 }
 0x347   : > { %1006 = vst.msk [vmem:[#allocation3 + $0x40] sm:$0xff] %vm981_vm5, %v2603_v56  ;;  %v1639_v20 = vpop.f32.mrb[10].mxu1 }
 0x348   : > { %v2609_v7 = vadd.f32 %v1639_v20, %v960_v45  ;;  %v872_v11 = vpop.f32.mrb[11].mxu1  ;;  %v2795_v20 = vld [vmem:[#allocation15_spill] sm:$0xff] (!%p1498_p2) }
 0x349   : > { %v2611_v36 = vadd.f32 %v959_v6, %v872_v11  ;;  %v1183_v6 = vadd.s32 (!%p1498_p2), 8, %v2795_v20  ;;  %v1184_v11 = vadd.s32 (!%p1498_p2), 16, %v2795_v20  ;;  %v1185_v25 = vadd.s32 (!%p1498_p2), 24, %v2795_v20 }
 0x34a   : > { %1009 = vst.msk [vmem:[#allocation3 + $0x58] sm:$0xff] %vm981_vm5, %v2609_v7  ;;  %vm1200_vm6 = vcmp.eq.s32.totalorder (!%p1498_p2), %v2795_v20, %v1199_v5  ;;  %v1187_v61 = vadd.s32 (!%p1498_p2), 40, %v2795_v20  ;;  %v1188_v16 = vadd.s32 (!%p1498_p2), 48, %v2795_v20  ;;  %v1190_v19 = vadd.s32 (!%p1498_p2), 64, %v2795_v20 }
 0x34b   : > { %1008 = vst.msk [vmem:[#allocation3 + $0x50] sm:$0xff] %vm981_vm5, %v2611_v36  ;;  %v1642_v33 = vpop.f32.mrb[12].mxu1  ;;  %vm1201_vm7 = vcmp.eq.s32.totalorder (!%p1498_p2), %v1183_v6, %v1199_v5  ;;  %vm1202_vm8 = vcmp.eq.s32.totalorder (!%p1498_p2), %v1184_v11, %v1199_v5  ;;  %vm1203_vm9 = vcmp.eq.s32.totalorder (!%p1498_p2), %v1185_v25, %v1199_v5  ;;  %v1191_v25 = vadd.s32 (!%p1498_p2), 72, %v2795_v20 }
 0x34c   : > { %v2617_v58 = vadd.f32 %v1642_v33, %v962_v40  ;;  %v882_v23 = vpop.f32.mrb[13].mxu1  ;;  %v1186_v40 = vadd.s32 (!%p1498_p2), 32, %v2795_v20  ;;  %v1216_v33 = vsel (!%p1498_p2), %vm1200_vm6, %v2797_v3, 0.0  ;;  %vm1205_vm11 = vcmp.eq.s32.totalorder (!%p1498_p2), %v1187_v61, %v1199_v5 }
 0x34d   : > { %v2619_v22 = vadd.f32 %v961_v15, %v882_v23  ;;  %1180 = sbr.rel (%p1498_p2) target bundleno = 1087 (0x43f), region = 89  ;;  %v1217_v15 = vsel (!%p1498_p2), %vm1201_vm7, %v2198_v35, 0.0  ;;  %v1218_v23 = vsel (!%p1498_p2), %vm1202_vm8, %v2798_v24, 0.0  ;;  %vm1206_vm12 = vcmp.eq.s32.totalorder (!%p1498_p2), %v1188_v16, %v1199_v5  ;;  %v2799_v16 = vld [vmem:[#allocation14_spill] sm:$0xff] (!%p1498_p2) }
 0x34e   : > { %1011 = vst.msk [vmem:[#allocation3 + $0x68] sm:$0xff] %vm981_vm5, %v2617_v58  ;;  %vm1204_vm10 = vcmp.eq.s32.totalorder (!%p1498_p2), %v1186_v40, %v1199_v5  ;;  %v1221_v11 = vsel (!%p1498_p2), %vm1205_vm11, %v2204_v41, 0.0  ;;  %v1222_v40 = vsel (!%p1498_p2), %vm1206_vm12, %v2207_v42, 0.0  ;;  %vm1208_vm14 = vcmp.eq.s32.totalorder (!%p1498_p2), %v1190_v19, %v1199_v5 }
 0x34f   : > { %1010 = vst.msk [vmem:[#allocation3 + $0x60] sm:$0xff] %vm981_vm5, %v2619_v22  ;;  %v1645_v57 = vpop.f32.mrb[14].mxu1  ;;  %v1220_v6 = vsel (!%p1498_p2), %vm1204_vm10, %v2202_v38, 0.0  ;;  %v1193_v38 = vadd.s32 (!%p1498_p2), 88, %v2795_v20  ;;  %vm1209_vm15 = vcmp.eq.s32.totalorder (!%p1498_p2), %v1191_v25, %v1199_v5  ;;  %v1224_v24 = vsel (!%p1498_p2), %vm1208_vm14, %v2213_v46, 0.0 }
 0x350   : > { %v2625_v12 = vadd.f32 %v1645_v57, %v964_v27  ;;  %v892_v45 = vpop.f32.mrb[15].mxu1  ;;  %v1233_v27 = vadd.f32 (!%p1498_p2), %v1217_v15, %v1216_v33  ;;  %v1219_v57 = vsel (!%p1498_p2), %vm1203_vm9, %v2196_v34, 0.0  ;;  %v1192_v34 = vadd.s32 (!%p1498_p2), 80, %v2795_v20 }
 0x351   : > { %v2627_v52 = vadd.f32 %v963_v59, %v892_v45  ;;  %v1189_v59 = vadd.s32 (!%p1498_p2), 56, %v2795_v20  ;;  %v1194_v41 = vadd.s32 (!%p1498_p2), 96, %v2795_v20  ;;  %v1195_v42 = vadd.s32 (!%p1498_p2), 104, %v2795_v20 }
 0x352   : > { %1013 = vst.msk [vmem:[#allocation3 + $0x78] sm:$0xff] %vm981_vm5, %v2625_v12  ;;  %v1234_v45 = vadd.f32 (!%p1498_p2), %v1233_v27, %v1218_v23  ;;  %vm1210_vm0 = vcmp.eq.s32.totalorder (!%p1498_p2), %v1192_v34, %v1199_v5  ;;  %v1225_v27 = vsel (!%p1498_p2), %vm1209_vm15, %v2799_v16, 0.0  ;;  %vm1211_vm1 = vcmp.eq.s32.totalorder (!%p1498_p2), %v1193_v38, %v1199_v5 }
 0x353   : > { %1012 = vst.msk [vmem:[#allocation3 + $0x70] sm:$0xff] %vm981_vm5, %v2627_v52  ;;  %vm1207_vm13 = vcmp.eq.s32.totalorder (!%p1498_p2), %v1189_v59, %v1199_v5  ;;  %v1226_v59 = vsel (!%p1498_p2), %vm1210_vm0, %v2219_v50, 0.0  ;;  %vm1212_vm2 = vcmp.eq.s32.totalorder (!%p1498_p2), %v1194_v41, %v1199_v5  ;;  %v1197_v46 = vadd.s32 (!%p1498_p2), 120, %v2795_v20 }
 0x354   : > { %v1235_v35 = vadd.f32 %v1234_v45, %v1219_v57  ;;  %v1223_v15 = vsel %vm1207_vm13, %v2210_v43, 0.0  ;;  %v1196_v43 = vadd.s32 112, %v2795_v20  ;;  %vm1213_vm3 = vcmp.eq.s32.totalorder %v1195_v42, %v1199_v5 }
 0x355   : > { %v1229_v25 = vsel %vm1213_vm3, %v2244_v4, 0.0  ;;  %vm1215_vm6 = vcmp.eq.s32.totalorder %v1197_v46, %v1199_v5 }
 0x356   : > { %v1236_v3 = vadd.f32 %v1235_v35, %v1220_v6  ;;  %v1227_v6 = vsel %vm1211_vm1, %v2222_v51, 0.0  ;;  %v1228_v35 = vsel %vm1212_vm2, %v2235_v60, 0.0  ;;  %vm1214_vm4 = vcmp.eq.s32.totalorder %v1196_v43, %v1199_v5 }
 0x357   : > { %v1230_v50 = vsel %vm1214_vm4, %v2229_v55, 0.0  ;;  %v1231_v34 = vsel %vm1215_vm6, %v2240_v0, 0.0 }
 0x358   : > { %v1237_v33 = vadd.f32 %v1236_v3, %v1221_v11 }
 0x35a   : > { %v1238_v61 = vadd.f32 %v1237_v33, %v1222_v40 }
 0x35c   : > { %v1239_v23 = vadd.f32 %v1238_v61, %v1223_v15 }
 0x35e   : > { %v1240_v57 = vadd.f32 %v1239_v23, %v1224_v24 }
 0x360   : > { %v1241_v45 = vadd.f32 %v1240_v57, %v1225_v27 }
 0x362   : > { %v1242_v19 = vadd.f32 %v1241_v45, %v1226_v59 }
 0x364   : > { %v1243_v11 = vadd.f32 %v1242_v19, %v1227_v6 }
 0x366   : > { %v1244_v3 = vadd.f32 %v1243_v11, %v1228_v35 }
 0x368   : > { %v1245_v40 = vadd.f32 %v1244_v3, %v1229_v25 }
 0x36a   : > { %v1246_v33 = vadd.f32 %v1245_v40, %v1230_v50 }
 0x36c   : > { %v1247_v15 = vadd.f32 %v1246_v33, %v1231_v34 }
 0x36e   : > { %1248 = vadd.xlane.f32.xlu0 %v1247_v15 }
 0x3fb   : > { %v1249_v51 = vpop.xlane.xlu0 %1248 }
 0x3fc   : > { %v1250_v20 = vrot.slane %v1249_v51, 4 }
 0x3fe   : > { %v1251_v38 = vadd.f32 %v1250_v20, %v1249_v51 }
 0x400   : > { %v1252_v61 = vrot.slane %v1251_v38, 2 }
 0x402   : > { %v1253_v24 = vadd.f32 %v1252_v61, %v1251_v38 }
 0x404   : > { %v1254_v60 = vrot.slane %v1253_v24, 1 }
 0x406   : > { %v1255_v41 = vadd.f32 %v1254_v60, %v1253_v24 }
 0x408   : > { %1721 = vpush %v1255_v41 }
 0x439   : > { %s1722_s6 = spop %1721 }
 0x43a   : > { %s1257_s7 = smul.f32 2.0, %s1722_s6 }
 0x43c   : > { %s1258_s8 = ssub.f32 %s1232_s5, %s1257_s7 }
 0x43e   : > { %1260 = sst [smem:[#allocation6]] %s1258_s8 }
 0x43f PF: > { %p1261_p3 = scmp.eq.s32.totalorder %s2005_s16, 1  ;;  %p1499_p4 = scmp.ne.s32.totalorder %s2005_s16, 1 }
 0x440   : > { %1917 = vlog2.f32 (!%p1499_p4), %v2547_v30  ;;  %s1265_s9 = sld [smem:[#allocation6]] (!%p1499_p4) }
 0x441   : > { %1264 = sbr.rel (%p1499_p4) target bundleno = 1342 (0x53e), region = 93  ;;  %1919 = vlog2.f32 (!%p1499_p4), %v2545_v21 }
 0x442   : > { %1921 = vlog2.f32 (!%p1499_p4), %v2561_v17 }
 0x443   : > { %1923 = vlog2.f32 (!%p1499_p4), %v2559_v62 }
 0x444   : > { %1925 = vlog2.f32 (!%p1499_p4), %v2581_v49 }
 0x445   : > { %1927 = vlog2.f32 (!%p1499_p4), %v2579_v28 }
 0x446   : > { %1929 = vlog2.f32 (!%p1499_p4), %v2595_v13 }
 0x447   : > { %1931 = vlog2.f32 (!%p1499_p4), %v2593_v39 }
 0x448   : > { %1933 = vlog2.f32 %v2603_v56 }
 0x449   : > { %1935 = vlog2.f32 %v2601_v29 }
 0x44a   : > { %v1918_v55 = vpop.eup %1917  ;;  %1937 = vlog2.f32 %v2611_v36 }
 0x44b   : > { %v1920_v0 = vpop.eup %1919  ;;  %v1267_v4 = vmul.f32 0.6931472, %v1918_v55  ;;  %1939 = vlog2.f32 %v2609_v7 }
 0x44c   : > { %v1922_v21 = vpop.eup %1921  ;;  %v1269_v30 = vmul.f32 0.6931472, %v1920_v0  ;;  %1941 = vlog2.f32 %v2619_v22 }
 0x44d   : > { %v1924_v62 = vpop.eup %1923  ;;  %v1271_v17 = vmul.f32 0.6931472, %v1922_v21  ;;  %v1298_v28 = vadd.f32 %v1267_v4, %v2345_v2  ;;  %1943 = vlog2.f32 %v2617_v58 }
 0x44e   : > { %v1926_v49 = vpop.eup %1925  ;;  %v1273_v13 = vmul.f32 0.6931472, %v1924_v62  ;;  %v1299_v39 = vadd.f32 %v1269_v30, %v2365_v10  ;;  %1945 = vlog2.f32 %v2627_v52 }
 0x44f   : > { %v1928_v56 = vpop.eup %1927  ;;  %v1275_v5 = vmul.f32 0.6931472, %v1926_v49  ;;  %v1300_v29 = vadd.f32 %v1271_v17, %v2342_v54  ;;  %v1314_v36 = vsel %vm981_vm5, %v1298_v28, 0.0  ;;  %1947 = vlog2.f32 %v2625_v12 }
 0x450   : > { %v1930_v23 = vpop.eup %1929  ;;  %v1277_v16 = vmul.f32 0.6931472, %v1928_v56  ;;  %v1301_v7 = vadd.f32 %v1273_v13, %v2362_v8  ;;  %v1315_v2 = vsel %vm981_vm5, %v1299_v39, 0.0 }
 0x451   : > { %v1932_v27 = vpop.eup %1931  ;;  %v1279_v42 = vmul.f32 0.6931472, %v1930_v23  ;;  %v1302_v10 = vadd.f32 %v1275_v5, %v2381_v18  ;;  %v1316_v57 = vadd.f32 %v1315_v2, %v1314_v36  ;;  %v1317_v59 = vsel %vm981_vm5, %v1300_v29, 0.0 }
 0x452   : > { %v1934_v22 = vpop.eup %1933  ;;  %v1281_v43 = vmul.f32 0.6931472, %v1932_v27  ;;  %v1303_v54 = vadd.f32 %v1277_v16, %v2391_v26  ;;  %v1319_v45 = vsel %vm981_vm5, %v1301_v7, 0.0 }
 0x453   : > { %v1936_v6 = vpop.eup %1935  ;;  %v1318_v58 = vadd.f32 %v1317_v59, %v1316_v57  ;;  %v1283_v8 = vmul.f32 0.6931472, %v1934_v22  ;;  %v1304_v46 = vadd.f32 %v1279_v42, %v2400_v32  ;;  %v1321_v19 = vsel %vm981_vm5, %v1302_v10, 0.0 }
 0x454   : > { %v1938_v35 = vpop.eup %1937  ;;  %v1285_v11 = vmul.f32 0.6931472, %v1936_v6  ;;  %v1305_v25 = vadd.f32 %v1281_v43, %v2409_v37  ;;  %v1323_v26 = vsel %vm981_vm5, %v1303_v54, 0.0 }
 0x455   : > { %v1320_v18 = vadd.f32 %v1319_v45, %v1318_v58  ;;  %v1940_v3 = vpop.eup %1939  ;;  %v1287_v40 = vmul.f32 0.6931472, %v1938_v35  ;;  %v1306_v52 = vadd.f32 %v1283_v8, %v2419_v47  ;;  %v1325_v34 = vsel %vm981_vm5, %v1304_v46, 0.0 }
 0x456   : > { %v1942_v33 = vpop.eup %1941  ;;  %v1289_v51 = vmul.f32 0.6931472, %v1940_v3  ;;  %v1307_v20 = vadd.f32 %v1285_v11, %v2424_v53  ;;  %v1327_v12 = vsel %vm981_vm5, %v1305_v25, 0.0 }
 0x457   : > { %v1322_v50 = vadd.f32 %v1321_v19, %v1320_v18  ;;  %v1944_v15 = vpop.eup %1943  ;;  %v1291_v61 = vmul.f32 0.6931472, %v1942_v33  ;;  %v1308_v37 = vadd.f32 %v1287_v40, %v2439_v63  ;;  %v1329_v24 = vsel %vm981_vm5, %v1306_v52, 0.0 }
 0x458   : > { %v1946_v60 = vpop.eup %1945  ;;  %v1293_v55 = vmul.f32 0.6931472, %v1944_v15  ;;  %v1309_v47 = vadd.f32 %v1289_v51, %v2444_v9  ;;  %v1331_v0 = vsel %vm981_vm5, %v1307_v20, 0.0 }
 0x459   : > { %v1324_v32 = vadd.f32 %v1323_v26, %v1322_v50  ;;  %v1948_v4 = vpop.eup %1947  ;;  %v1295_v30 = vmul.f32 0.6931472, %v1946_v60  ;;  %v1310_v53 = vadd.f32 %v1291_v61, %v2459_v44  ;;  %v1333_v62 = vsel %vm981_vm5, %v1308_v37, 0.0 }
 0x45a   : > { %v1297_v28 = vmul.f32 0.6931472, %v1948_v4  ;;  %v1311_v63 = vadd.f32 %v1293_v55, %v2464_v1  ;;  %v1335_v49 = vsel %vm981_vm5, %v1309_v47, 0.0 }
 0x45b   : > { %v1326_v38 = vadd.f32 %v1325_v34, %v1324_v32  ;;  %v1312_v39 = vadd.f32 %v1295_v30, %v2479_v48  ;;  %v1337_v9 = vsel %vm981_vm5, %v1310_v53, 0.0 }
 0x45c   : > { %v1313_v5 = vadd.f32 %v1297_v28, %v2482_v14  ;;  %v1339_v29 = vsel %vm981_vm5, %v1311_v63, 0.0 }
 0x45d   : > { %v1328_v41 = vadd.f32 %v1327_v12, %v1326_v38  ;;  %v1341_v44 = vsel %vm981_vm5, %v1312_v39, 0.0 }
 0x45e   : > { %v1343_v16 = vsel %vm981_vm5, %v1313_v5, 0.0 }
 0x45f   : > { %v1330_v21 = vadd.f32 %v1329_v24, %v1328_v41 }
 0x461   : > { %v1332_v17 = vadd.f32 %v1331_v0, %v1330_v21 }
 0x463   : > { %v1334_v13 = vadd.f32 %v1333_v62, %v1332_v17 }
 0x465   : > { %v1336_v56 = vadd.f32 %v1335_v49, %v1334_v13 }
 0x467   : > { %v1338_v36 = vadd.f32 %v1337_v9, %v1336_v56 }
 0x469   : > { %v1340_v23 = vadd.f32 %v1339_v29, %v1338_v36 }
 0x46b   : > { %v1342_v7 = vadd.f32 %v1341_v44, %v1340_v23 }
 0x46d   : > { %v1344_v1 = vadd.f32 %v1343_v16, %v1342_v7 }
 0x46f   : > { %1345 = vadd.xlane.f32.xlu0 %v1344_v1 }
 0x4fc   : > { %v1346_v2 = vpop.xlane.xlu0 %1345 }
 0x4fd   : > { %v1347_v27 = vrot.slane %v1346_v2, 4 }
 0x4ff   : > { %v1348_v42 = vadd.f32 %v1347_v27, %v1346_v2 }
 0x501   : > { %v1349_v48 = vrot.slane %v1348_v42, 2 }
 0x503   : > { %v1350_v10 = vadd.f32 %v1349_v48, %v1348_v42 }
 0x505   : > { %v1351_v57 = vrot.slane %v1350_v10, 1 }
 0x507   : > { %v1352_v59 = vadd.f32 %v1351_v57, %v1350_v10 }
 0x509   : > { %1723 = vpush %v1352_v59 }
 0x53a   : > { %s1724_s10 = spop %1723 }
 0x53b   : > { %s1354_s11 = sadd.f32 %s1724_s10, %s1265_s9 }
 0x53d   : > { %1356 = sst [smem:[#allocation6]] %s1354_s11 }
 0x53e PF: > { %p1357_p5 = scmp.eq.s32.totalorder %s2009_s17, 1  ;;  %p1500_p6 = scmp.ne.s32.totalorder %s2009_s17, 1 }
 0x53f   : > { %1949 = vlog2.f32 (!%p1500_p6), %v2513_v31  ;;  %vm1365_vm5 = vcmask (!%p1500_p6), 1040384   ;;  %v2800_v43 = vld [vmem:[#allocation16_spill] sm:$0xff] (!%p1500_p6)  ;;  %s1361_s12 = sld [smem:[#allocation6]] (!%p1500_p6) }
 0x540   : > { %1360 = sbr.rel (%p1500_p6) target bundleno = 1566 (0x61e), region = 97 }
 0x549   : > { %v1950_v14 = vpop.eup %1949 }
 0x54a   : > { %v1363_v22 = vmul.f32 0.6931472, %v1950_v14 }
 0x54c   : > { %v1364_v54 = vadd.f32 %v1363_v22, %v2800_v43 }
 0x54e   : > { %v1366_v45 = vsel %vm1365_vm5, %v1364_v54, 0.0 }
 0x54f   : > { %1367 = vadd.xlane.f32.xlu0 %v1366_v45 }
 0x5dc   : > { %v1368_v6 = vpop.xlane.xlu0 %1367 }
 0x5dd   : > { %v1369_v58 = vrot.slane %v1368_v6, 4 }
 0x5df   : > { %v1370_v8 = vadd.f32 %v1369_v58, %v1368_v6 }
 0x5e1   : > { %v1371_v46 = vrot.slane %v1370_v8, 2 }
 0x5e3   : > { %v1372_v19 = vadd.f32 %v1371_v46, %v1370_v8 }
 0x5e5   : > { %v1373_v35 = vrot.slane %v1372_v19, 1 }
 0x5e7   : > { %v1374_v18 = vadd.f32 %v1373_v35, %v1372_v19 }
 0x5e9   : > { %1725 = vpush %v1374_v18 }
 0x61a   : > { %s1726_s13 = spop %1725 }
 0x61b   : > { %s1376_s23 = sadd.f32 %s1726_s13, %s1361_s12 }
 0x61d   : > { %1378 = sst [smem:[#allocation6]] %s1376_s23 }
 0x61e PF: > { %p1379_p7 = pnand %p1357_p5, %p1261_p3  ;;  %s1383_s24 = sld [smem:[#allocation6]] }
 0x61f   : > { %p1735_p8 = scmp.eq.s32.totalorder %s1466_s0, 3  ;;  %s1951_s28 = scalar_lea.hbm %s2764_s3, 16 }
 0x620   : > { %p1952_p9 = scmp.ne.s32.totalorder %s2764_s3, %s1951_s28  ;;  %p1957_p12 = scmp.lt.u32.totalorder %s1951_s28, %s2764_s3 }
 0x622   : > { %p1953_p10 = pnand %p1952_p9, %p1735_p8 }
 0x624   : > { %s1384_s26 = smul.f32 0.001953125, %s1383_s24  ;;  %p1954_p11 = pneg %p1953_p10 }
 0x626   : > { %1730 = sst [smem:[#allocation9]] (!%p1379_p7), %s1384_s26  ;;  %p1959_p13 = pnand %p1957_p12, %p1954_p11 }
 0x628   : > { %1962 = shalt.err (!%p1959_p13)
}
 0x629   : > { %s2034_s17 = smov [#allocation9]  }
 0x62a   : > { %1732 = dma.smem_to_hbm (%p1735_p8), %s2034_s17, 16, %s2764_s3, [#allocation10]  }
 0x62b   : > { %1992 = dma.done.wait (%p1735_p8), [#allocation10], 16  }
 0x62c   : > { %1994 = vsyncadd (%p1735_p8), [#allocation10], 4294967280 }
 0x62d   : > { %1400 = sfence }
 0x62e PF: > { %s15_s20 = sadd.s32 1, %s2021_s20   ;;  %s2801_s14 = smov %s2001_s15 }
 0x62f   : > { %p12_p0 = scmp.ge.s32.totalorder %s15_s20, 6   ;;  %s2802_s15 = smov %s2108_s25 }
 0x630   : > { %s2803_s16 = smov %s2013_s18  ;;  %s2804_s17 = smov %s2017_s19 }
 0x631   : > { %s2805_s18 = smov %s2808_s21  ;;  %s2806_s19 = smov %s2812_s22 }
 0x632   :  { %14 = sbr.rel (!%p12_p0) target bundleno = 6 (0x6), region = 145 }
 0x639   :  { %1406 = vsyncpa [#allocation10], 1 }
 0x63a   :  { %1408 = vsyncpa [#allocation10 + $0x1], 1 }

</bundles_post_ra>
